<compile_context>
chip_gen: v6e
topology: v6e:2x2x1
jax: 0.10.0
libtpu: 0.0.40
codegen_flags: <defaults>
</compile_context>

<pallas_src>
import functools

import jax
import jax.numpy as jnp
import numpy as np
from jax.experimental import pallas as pl
from jax.experimental.pallas import tpu as pltpu


def _round_up(x, m):
    return (x + m - 1) // m * m


def _pick_tile_b(B):
    if B <= 512:
        return _round_up(B, 8)
    # Aim for >=4 grid steps (2 per TensorCore on v7x) so both cores get work
    # and activation double-buffering engages, while letting tiles grow up to
    # 2048 rows at large B to amortize the ~0.35us per-grid-step overhead.
    return int(min(2048, _round_up(max(B // 4, 256), 256)))


# --------------------------------------------------------------------------
# Kernel
# --------------------------------------------------------------------------
def cgc_kernel(n_e1_pad, n_gates, n_out,
               x_ref, w1_ref, b1_ref, w2_ref, b2_ref, segt_ref, segsum_ref,
               g_ref, p_ref, out_ref):
    """One batch tile of the fused CGC forward."""
    x = x_ref[...]                                   # (TILE_B, 3*D) = [xs|xt1|xt2]

    # ---- fused fc1 (all experts) + all gate logits: one MXU pass (f32 acc).
    fused = jnp.dot(x, w1_ref[...], preferred_element_type=jnp.float32) + b1_ref[...]

    # n_e1_pad is a multiple of 128, so both slices are lane-aligned views.
    h = jnp.maximum(fused[:, :n_e1_pad], 0.0).astype(w2_ref.dtype)
    # TODO(synk): nn.Dropout(0.3) training-mode mask/scale not reproduced
    # (eval-mode identity semantics are used).

    # ---- fused fc2: block-diagonal weight, one MXU pass.
    # y column order is by expert slab: [task1... | task2... | shared... | pad]
    y = jnp.dot(h, w2_ref[...], preferred_element_type=jnp.float32) + b2_ref[...]

    # ---- fused segmented softmax over all gates (per-segment max shift).
    glogits = fused[:, n_e1_pad:]                    # (TILE_B, GW_pad), aligned
    segt = segt_ref[...]                             # (n_gates, GW_pad) one-hot rows
    col_max = jnp.zeros_like(glogits)
    for gi in range(n_gates):                        # 2 or 3 iterations, static
        mask = segt[gi:gi + 1, :]                    # (1, GW_pad)
        mgi = jnp.max(jnp.where(mask > 0.5, glogits, -jnp.inf),
                      axis=1, keepdims=True)         # (TILE_B, 1)
        col_max = jnp.where(mask > 0.5, mgi, col_max)
    e = jnp.exp(glogits - col_max)                   # pad cols: exp(0) = 1 (killed below)
    # same-segment sum: denom[b, a] = sum_{a' in seg(a)} e[b, a']
    denom = jnp.dot(e, segsum_ref[...], preferred_element_type=jnp.float32)
    inv = pl.reciprocal(denom, approx=True)          # EUP seed
    inv = inv * (2.0 - denom * inv)                  # one Newton step -> full f32 accuracy
    gates = e * inv                                  # pad columns -> 1, zeroed by G rows

    # ---- gate-weighted combine as matmuls (no lane extracts, no concat).
    # out = sum_k (y * (gates @ G_k)) @ P_k ; output slabs are disjoint columns.
    out_acc = None
    for k in range(n_out):                           # 2 or 3 iterations, static
        scale = jnp.dot(gates, g_ref[k], preferred_element_type=jnp.float32)
        contrib = jnp.dot(y * scale, p_ref[k], preferred_element_type=jnp.float32)
        out_acc = contrib if out_acc is None else out_acc + contrib
    out_ref[...] = out_acc                           # single lane-dense store


# --------------------------------------------------------------------------
# Wrapper-side weight packing (done once, outside the kernel's critical path)
# --------------------------------------------------------------------------
def pack_cgc_params(params, *, num_specific, num_shared, if_last,
                    compute_dtype=jnp.float32):
    D = params["w1_t1"].shape[1]
    EO = params["w1_t1"].shape[2]       # fc1 output width ("experts_out" arg)
    EH = params["w2_t1"].shape[2]       # fc2 output width ("experts_hidden" arg)
    E_sp, E_sh = num_specific, num_shared
    E_tot = 2 * E_sp + E_sh

    n_e1 = E_tot * EO
    n_e1_pad = _round_up(n_e1, 128)     # lane-aligned expert/gate split
    Y_W = E_tot * EH
    Y_W_pad = _round_up(Y_W, 128)       # lane-dense expert-output slab

    gw1 = E_sp + E_sh
    gw2 = E_sp + E_sh
    gws = 2 * E_sp + E_sh
    gate_widths = [gw1, gw2] + ([] if if_last else [gws])
    GW = sum(gate_widths)
    GW_pad = _round_up(GW, 128)         # lane-dense gate-logit block
    n_gates = len(gate_widths)

    W1C = n_e1_pad + GW_pad

    # ---- fused W1: rows = [xs | xt1 | xt2] (3D), cols = [experts pad | gates pad]
    w1_big = np.zeros((3 * D, W1C), np.float32)
    b1_big = np.zeros((W1C,), np.float32)

    def put_w1(col_off, w, b, which):   # which: 0 -> xs rows, 1 -> xt1, 2 -> xt2
        w = np.asarray(w); b = np.asarray(b)
        w1_big[which * D:(which + 1) * D, col_off:col_off + w.shape[1]] = w
        b1_big[col_off:col_off + w.shape[1]] = b

    col = 0                              # expert slab order: task1, task2, shared
    for e in range(E_sp):
        put_w1(col, params["w1_t1"][e], params["b1_t1"][e], 1); col += EO
    for e in range(E_sp):
        put_w1(col, params["w1_t2"][e], params["b1_t2"][e], 2); col += EO
    for e in range(E_sh):
        put_w1(col, params["w1_sh"][e], params["b1_sh"][e], 0); col += EO
    col = n_e1_pad                       # gates start at the padded boundary
    put_w1(col, params["wg1"], params["bg1"], 1); col += gw1
    put_w1(col, params["wg2"], params["bg2"], 2); col += gw2
    if not if_last:
        put_w1(col, params["wgs"], params["bgs"], 0); col += gws

    # ---- block-diagonal fc2 (padded rows/cols are zero)
    w2_big = np.zeros((n_e1_pad, Y_W_pad), np.float32)
    b2_big = np.zeros((Y_W_pad,), np.float32)
    w2_list = ([params["w2_t1"][e] for e in range(E_sp)]
               + [params["w2_t2"][e] for e in range(E_sp)]
               + [params["w2_sh"][e] for e in range(E_sh)])
    b2_list = ([params["b2_t1"][e] for e in range(E_sp)]
               + [params["b2_t2"][e] for e in range(E_sp)]
               + [params["b2_sh"][e] for e in range(E_sh)])
    for k, (w2, b2) in enumerate(zip(w2_list, b2_list)):
        w2_big[k * EO:(k + 1) * EO, k * EH:(k + 1) * EH] = np.asarray(w2)
        b2_big[k * EH:(k + 1) * EH] = np.asarray(b2)

    # ---- per-gate one-hot rows (for per-segment max / broadcast)
    segt = np.zeros((n_gates, GW_pad), np.float32)
    off = 0
    for gi, w in enumerate(gate_widths):
        segt[gi, off:off + w] = 1.0
        off += w
    # same-segment sum matrix; identity on pad columns keeps the reciprocal
    # finite there (those gate values are then killed by the zero G rows).
    segsum = segt.T @ segt
    for p in range(GW, GW_pad):
        segsum[p, p] = 1.0

    # ---- combine matrices (expand G: gate cols -> y cols; collapse P: y cols -> out slab)
    n_out = 2 if if_last else 3
    OUT_PAD = _round_up(n_out * EH, 128)

    slabs_t1 = list(range(E_sp)) + list(range(2 * E_sp, E_tot))
    slabs_t2 = list(range(E_sp, 2 * E_sp)) + list(range(2 * E_sp, E_tot))
    slabs_sh = list(range(E_tot))

    def gate_G(offset, slabs):
        G = np.zeros((GW_pad, Y_W_pad), np.float32)
        for a, s in enumerate(slabs):
            G[offset + a, s * EH:(s + 1) * EH] = 1.0
        return G

    def out_P(k):
        P = np.zeros((Y_W_pad, OUT_PAD), np.float32)
        eye = np.eye(EH, dtype=np.float32)
        for s in range(E_tot):
            P[s * EH:(s + 1) * EH, k * EH:(k + 1) * EH] = eye
        return P

    if if_last:   # output slabs: [task1, task2]
        G_list = [gate_G(0, slabs_t1), gate_G(gw1, slabs_t2)]
    else:         # output slabs: [shared, task1, task2]
        G_list = [gate_G(gw1 + gw2, slabs_sh), gate_G(0, slabs_t1), gate_G(gw1, slabs_t2)]
    P_list = [out_P(k) for k in range(n_out)]

    # Big streamed operands may be bf16 (v6e/v7x); small resident control
    # matrices, biases and all softmax/combine math stay f32.
    return dict(
        w1=jnp.asarray(w1_big, compute_dtype),
        b1=jnp.asarray(b1_big.reshape(1, -1), jnp.float32),
        w2=jnp.asarray(w2_big, compute_dtype),
        b2=jnp.asarray(b2_big.reshape(1, -1), jnp.float32),
        segt=jnp.asarray(segt, jnp.float32),
        segsum=jnp.asarray(segsum, jnp.float32),
        G=jnp.asarray(np.stack(G_list), jnp.float32),
        P=jnp.asarray(np.stack(P_list), jnp.float32),
        dims=dict(D=D, EO=EO, EH=EH, n_e1_pad=n_e1_pad, GW_pad=GW_pad,
                  Y_W_pad=Y_W_pad, OUT_PAD=OUT_PAD, W1C=W1C,
                  n_gates=n_gates, n_out=n_out),
    )


# --------------------------------------------------------------------------
# Forward wrapper
# --------------------------------------------------------------------------
def cgc_forward(packed, inputs, *, if_last):
    xs, xt1, xt2 = inputs
    B = xs.shape[0]
    d = packed["dims"]
    D, EH = d["D"], d["EH"]
    n_e1_pad, GW_pad = d["n_e1_pad"], d["GW_pad"]
    Y_W_pad, OUT_PAD, W1C = d["Y_W_pad"], d["OUT_PAD"], d["W1C"]
    n_gates, n_out = d["n_gates"], d["n_out"]

    x_cat = jnp.concatenate([xs, xt1, xt2], axis=1).astype(packed["w1"].dtype)

    TILE_B = _pick_tile_b(B)
    B_pad = _round_up(B, TILE_B)
    if B_pad != B:
        x_cat = jnp.pad(x_cat, ((0, B_pad - B), (0, 0)))

    kernel = functools.partial(cgc_kernel, n_e1_pad, n_gates, n_out)

    out = pl.pallas_call(
        kernel,
        out_shape=jax.ShapeDtypeStruct((B_pad, OUT_PAD), jnp.float32),
        grid=(B_pad // TILE_B,),
        in_specs=[
            pl.BlockSpec((TILE_B, 3 * D), lambda i: (i, 0)),           # x_cat tile
            pl.BlockSpec((3 * D, W1C), lambda i: (0, 0)),              # fused W1+gates
            pl.BlockSpec((1, W1C), lambda i: (0, 0)),                  # fused b1+gate bias
            pl.BlockSpec((n_e1_pad, Y_W_pad), lambda i: (0, 0)),       # block-diag W2
            pl.BlockSpec((1, Y_W_pad), lambda i: (0, 0)),              # fused b2
            pl.BlockSpec((n_gates, GW_pad), lambda i: (0, 0)),         # gate one-hot rows
            pl.BlockSpec((GW_pad, GW_pad), lambda i: (0, 0)),          # same-segment sum
            pl.BlockSpec((n_out, GW_pad, Y_W_pad), lambda i: (0, 0, 0)),   # G expand
            pl.BlockSpec((n_out, Y_W_pad, OUT_PAD), lambda i: (0, 0, 0)),  # P collapse
        ],
        out_specs=pl.BlockSpec((TILE_B, OUT_PAD), lambda i: (i, 0)),   # lane-dense store
        compiler_params=pltpu.CompilerParams(
            dimension_semantics=("parallel",)),
    )(x_cat, packed["w1"], packed["b1"], packed["w2"], packed["b2"],
      packed["segt"], packed["segsum"], packed["G"], packed["P"])

    out = out[:B]
    if if_last:
        return [out[:, 0:EH], out[:, EH:2 * EH]]                        # [task1, task2]
    return [out[:, 0:EH], out[:, EH:2 * EH], out[:, 2 * EH:3 * EH]]     # [shared, t1, t2]


# --------------------------------------------------------------------------
# Pure-JAX reference (mirrors the PyTorch forward) for verification
# --------------------------------------------------------------------------
def cgc_reference(params, inputs, *, num_specific, num_shared, if_last):
    xs, xt1, xt2 = inputs

    def expert(x, w1, b1, w2, b2):
        h = jnp.maximum(x @ w1 + b1, 0.0)
        return h @ w2 + b2

    def softmax(z):
        z = z - jnp.max(z, axis=1, keepdims=True)
        e = jnp.exp(z)
        return e / jnp.sum(e, axis=1, keepdims=True)

    sh = jnp.stack([expert(xs, params["w1_sh"][e], params["b1_sh"][e],
                           params["w2_sh"][e], params["b2_sh"][e])
                    for e in range(num_shared)])
    t1 = jnp.stack([expert(xt1, params["w1_t1"][e], params["b1_t1"][e],
                           params["w2_t1"][e], params["b2_t1"][e])
                    for e in range(num_specific)])
    t2 = jnp.stack([expert(xt2, params["w1_t2"][e], params["b1_t2"][e],
                           params["w2_t2"][e], params["b2_t2"][e])
                    for e in range(num_specific)])

    g1 = softmax(xt1 @ params["wg1"] + params["bg1"])
    g2 = softmax(xt2 @ params["wg2"] + params["bg2"])
    gs = softmax(xs @ params["wgs"] + params["bgs"])

    out1 = jnp.einsum("abc,ba->bc", jnp.concatenate([t1, sh], axis=0), g1)
    out2 = jnp.einsum("abc,ba->bc", jnp.concatenate([t2, sh], axis=0), g2)
    outs = jnp.einsum("abc,ba->bc", jnp.concatenate([t1, t2, sh], axis=0), gs)

    if if_last:
        return [out1, out2]
    return [outs, out1, out2]


# --------------------------------------------------------------------------
# Deterministic parameter init (PyTorch Linear-style uniform bounds)
# --------------------------------------------------------------------------
def init_params(key, input_size, num_specific, num_shared, experts_out, experts_hidden):
    def linear(k, fan_in, fan_out):
        kw, kb = jax.random.split(k)
        bound = 1.0 / np.sqrt(fan_in)
        w = jax.random.uniform(kw, (fan_in, fan_out), jnp.float32, -bound, bound)
        b = jax.random.uniform(kb, (fan_out,), jnp.float32, -bound, bound)
        return w, b

    def expert_stack(k, n):
        w1s, b1s, w2s, b2s = [], [], [], []
        for kk in jax.random.split(k, n):
            k1, k2 = jax.random.split(kk)
            w1, b1 = linear(k1, input_size, experts_out)      # fc1
            w2, b2 = linear(k2, experts_out, experts_hidden)  # fc2
            w1s.append(w1); b1s.append(b1); w2s.append(w2); b2s.append(b2)
        return (jnp.stack(w1s), jnp.stack(b1s), jnp.stack(w2s), jnp.stack(b2s))

    k_sh, k_t1, k_t2, k_g1, k_g2, k_gs = jax.random.split(key, 6)
    w1_sh, b1_sh, w2_sh, b2_sh = expert_stack(k_sh, num_shared)
    w1_t1, b1_t1, w2_t1, b2_t1 = expert_stack(k_t1, num_specific)
    w1_t2, b1_t2, w2_t2, b2_t2 = expert_stack(k_t2, num_specific)

    wg1, bg1 = linear(k_g1, input_size, num_specific + num_shared)
    wg2, bg2 = linear(k_g2, input_size, num_specific + num_shared)
    wgs, bgs = linear(k_gs, input_size, num_specific * 2 + num_shared)

    return dict(
        w1_sh=w1_sh, b1_sh=b1_sh, w2_sh=w2_sh, b2_sh=b2_sh,
        w1_t1=w1_t1, b1_t1=b1_t1, w2_t1=w2_t1, b2_t1=b2_t1,
        w1_t2=w1_t2, b1_t2=b1_t2, w2_t2=w2_t2, b2_t2=b2_t2,
        wg1=wg1, bg1=bg1, wg2=wg2, bg2=bg2, wgs=wgs, bgs=bgs,
    )


# --------------------------------------------------------------------------
if __name__ == "__main__":
    B = 8
    input_size = 32
    num_specific_experts = 2
    num_shared_experts = 2
    experts_out = 16      # Expert fc1 output ( = "experts_out" ctor arg )
    experts_hidden = 32   # Expert fc2 output ( = "experts_hidden" ctor arg )

    key = jax.random.PRNGKey(0)
    k_p, k_xs, k_x1, k_x2 = jax.random.split(key, 4)

    params = init_params(k_p, input_size, num_specific_experts,
                         num_shared_experts, experts_out, experts_hidden)

    xs = jax.random.normal(k_xs, (B, input_size), jnp.float32)
    xt1 = jax.random.normal(k_x1, (B, input_size), jnp.float32)
    xt2 = jax.random.normal(k_x2, (B, input_size), jnp.float32)
    inputs = (xs, xt1, xt2)

    # f32 path: exact-mode verification against the pure-JAX reference.
    for if_last in (False, True):
        packed = pack_cgc_params(params, num_specific=num_specific_experts,
                                 num_shared=num_shared_experts, if_last=if_last,
                                 compute_dtype=jnp.float32)
        outs = jax.block_until_ready(cgc_forward(packed, inputs, if_last=if_last))
        refs = cgc_reference(params, inputs,
                             num_specific=num_specific_experts,
                             num_shared=num_shared_experts, if_last=if_last)
        for o, r in zip(outs, refs):
            np.testing.assert_allclose(np.asarray(o), np.asarray(r),
                                       rtol=2e-5, atol=2e-5)

    # bf16 path (v6e/v7x recommendation): bf16 x/W1/W2, f32 accumulation.
    packed_bf16 = pack_cgc_params(params, num_specific=num_specific_experts,
                                  num_shared=num_shared_experts, if_last=False,
                                  compute_dtype=jnp.bfloat16)
    outs_bf16 = jax.block_until_ready(cgc_forward(packed_bf16, inputs, if_last=False))
    refs = cgc_reference(params, inputs, num_specific=num_specific_experts,
                         num_shared=num_shared_experts, if_last=False)
    for o, r in zip(outs_bf16, refs):
        np.testing.assert_allclose(np.asarray(o), np.asarray(r),
                                   rtol=5e-2, atol=5e-2)

    print("KERNEL_OK")
</pallas_src>

<mosaic_0001>
module attributes {stable_mosaic.version = 11 : i64} {
  func.func @cgc_kernel(%arg0: i32, %arg1: memref<8x96xf32, #tpu.memory_space<vmem>>, %arg2: memref<96x256xf32, #tpu.memory_space<vmem>>, %arg3: memref<1x256xf32, #tpu.memory_space<vmem>>, %arg4: memref<128x256xf32, #tpu.memory_space<vmem>>, %arg5: memref<1x256xf32, #tpu.memory_space<vmem>>, %arg6: memref<3x128xf32, #tpu.memory_space<vmem>>, %arg7: memref<128x128xf32, #tpu.memory_space<vmem>>, %arg8: memref<3x128x256xf32, #tpu.memory_space<vmem>>, %arg9: memref<3x256x128xf32, #tpu.memory_space<vmem>>, %arg10: memref<8x128xf32, #tpu.memory_space<vmem>>) attributes {dimension_semantics = [#tpu.dimension_semantics<parallel>], iteration_bounds = array<i64: 1>, scalar_prefetch = 0 : i64, scratch_operands = 0 : i64, tpu.core_type = #tpu.core_type<tc>, window_params = [{transform_indices = @transform_0, window_bounds = array<i64: 8, 96>}, {pipeline_mode = #tpu.pipeline_mode<synchronous>, transform_indices = @transform_1, window_bounds = array<i64: 96, 256>}, {pipeline_mode = #tpu.pipeline_mode<synchronous>, transform_indices = @transform_2, window_bounds = array<i64: 1, 256>}, {pipeline_mode = #tpu.pipeline_mode<synchronous>, transform_indices = @transform_3, window_bounds = array<i64: 128, 256>}, {pipeline_mode = #tpu.pipeline_mode<synchronous>, transform_indices = @transform_4, window_bounds = array<i64: 1, 256>}, {pipeline_mode = #tpu.pipeline_mode<synchronous>, transform_indices = @transform_5, window_bounds = array<i64: 3, 128>}, {pipeline_mode = #tpu.pipeline_mode<synchronous>, transform_indices = @transform_6, window_bounds = array<i64: 128, 128>}, {pipeline_mode = #tpu.pipeline_mode<synchronous>, transform_indices = @transform_7, window_bounds = array<i64: 3, 128, 256>}, {pipeline_mode = #tpu.pipeline_mode<synchronous>, transform_indices = @transform_8, window_bounds = array<i64: 3, 256, 128>}, {transform_indices = @transform_9, window_bounds = array<i64: 8, 128>}]} {
    %c0 = arith.constant 0 : index
    %c0_0 = arith.constant 0 : index
    %0 = vector.load %arg1[%c0, %c0_0] : memref<8x96xf32, #tpu.memory_space<vmem>>, vector<8x96xf32>
    %c0_1 = arith.constant 0 : index
    %c0_2 = arith.constant 0 : index
    %1 = vector.load %arg2[%c0_1, %c0_2] : memref<96x256xf32, #tpu.memory_space<vmem>>, vector<96x256xf32>
    %cst = arith.constant dense<0.000000e+00> : vector<8x256xf32>
    %2 = tpu.matmul %0, %1, %cst {dimension_numbers = #tpu.dot_dimension_numbers<[1], [0], [0], [1], [0, 0, 1, 1], [], []>} : vector<8x96xf32>, vector<96x256xf32>, vector<8x256xf32> -> vector<8x256xf32>
    %c0_3 = arith.constant 0 : index
    %c0_4 = arith.constant 0 : index
    %3 = vector.load %arg3[%c0_3, %c0_4] : memref<1x256xf32, #tpu.memory_space<vmem>>, vector<1x256xf32>
    %4 = vector.broadcast %3 : vector<1x256xf32> to vector<8x256xf32>
    %5 = arith.addf %2, %4 : vector<8x256xf32>
    %6 = vector.extract_strided_slice %5 {offsets = [0, 0], sizes = [8, 128], strides = [1, 1]} : vector<8x256xf32> to vector<8x128xf32>
    %cst_5 = arith.constant 0.000000e+00 : f32
    %7 = vector.broadcast %cst_5 : f32 to vector<8x128xf32>
    %8 = arith.maximumf %6, %7 : vector<8x128xf32>
    %c0_6 = arith.constant 0 : index
    %c0_7 = arith.constant 0 : index
    %9 = vector.load %arg4[%c0_6, %c0_7] : memref<128x256xf32, #tpu.memory_space<vmem>>, vector<128x256xf32>
    %cst_8 = arith.constant dense<0.000000e+00> : vector<8x256xf32>
    %10 = tpu.matmul %8, %9, %cst_8 {dimension_numbers = #tpu.dot_dimension_numbers<[1], [0], [0], [1], [0, 0, 1, 1], [], []>} : vector<8x128xf32>, vector<128x256xf32>, vector<8x256xf32> -> vector<8x256xf32>
    %c0_9 = arith.constant 0 : index
    %c0_10 = arith.constant 0 : index
    %11 = vector.load %arg5[%c0_9, %c0_10] : memref<1x256xf32, #tpu.memory_space<vmem>>, vector<1x256xf32>
    %12 = vector.broadcast %11 : vector<1x256xf32> to vector<8x256xf32>
    %13 = arith.addf %10, %12 : vector<8x256xf32>
    %14 = vector.extract_strided_slice %5 {offsets = [0, 128], sizes = [8, 128], strides = [1, 1]} : vector<8x256xf32> to vector<8x128xf32>
    %c0_11 = arith.constant 0 : index
    %c0_12 = arith.constant 0 : index
    %15 = vector.load %arg6[%c0_11, %c0_12] : memref<3x128xf32, #tpu.memory_space<vmem>>, vector<3x128xf32>
    %cst_13 = arith.constant 0.000000e+00 : f32
    %16 = vector.broadcast %cst_13 : f32 to vector<8x128xf32>
    %17 = vector.extract_strided_slice %15 {offsets = [0, 0], sizes = [1, 128], strides = [1, 1]} : vector<3x128xf32> to vector<1x128xf32>
    %cst_14 = arith.constant 5.000000e-01 : f32
    %18 = vector.broadcast %cst_14 : f32 to vector<1x128xf32>
    %19 = arith.cmpf ogt, %17, %18 : vector<1x128xf32>
    %cst_15 = arith.constant 0xFF800000 : f32
    %20 = vector.shape_cast %19 : vector<1x128xi1> to vector<1x128xi1>
    %21 = vector.broadcast %20 : vector<1x128xi1> to vector<8x128xi1>
    %22 = vector.broadcast %cst_15 : f32 to vector<8x128xf32>
    %23 = arith.select %21, %14, %22 : vector<8x128xi1>, vector<8x128xf32>
    %cst_16 = arith.constant dense<0xFF800000> : vector<8xf32>
    %24 = vector.multi_reduction <maximumf>, %23, %cst_16 [1] : vector<8x128xf32> to vector<8xf32>
    %25 = vector.shape_cast %24 : vector<8xf32> to vector<8x1xf32>
    %cst_17 = arith.constant 5.000000e-01 : f32
    %26 = vector.broadcast %cst_17 : f32 to vector<1x128xf32>
    %27 = arith.cmpf ogt, %17, %26 : vector<1x128xf32>
    %28 = vector.shape_cast %27 : vector<1x128xi1> to vector<1x128xi1>
    %29 = vector.broadcast %28 : vector<1x128xi1> to vector<8x128xi1>
    %30 = vector.shape_cast %25 : vector<8x1xf32> to vector<8x1xf32>
    %31 = vector.broadcast %30 : vector<8x1xf32> to vector<8x128xf32>
    %32 = arith.select %29, %31, %16 : vector<8x128xi1>, vector<8x128xf32>
    %33 = vector.extract_strided_slice %15 {offsets = [1, 0], sizes = [1, 128], strides = [1, 1]} : vector<3x128xf32> to vector<1x128xf32>
    %cst_18 = arith.constant 5.000000e-01 : f32
    %34 = vector.broadcast %cst_18 : f32 to vector<1x128xf32>
    %35 = arith.cmpf ogt, %33, %34 : vector<1x128xf32>
    %cst_19 = arith.constant 0xFF800000 : f32
    %36 = vector.shape_cast %35 : vector<1x128xi1> to vector<1x128xi1>
    %37 = vector.broadcast %36 : vector<1x128xi1> to vector<8x128xi1>
    %38 = vector.broadcast %cst_19 : f32 to vector<8x128xf32>
    %39 = arith.select %37, %14, %38 : vector<8x128xi1>, vector<8x128xf32>
    %cst_20 = arith.constant dense<0xFF800000> : vector<8xf32>
    %40 = vector.multi_reduction <maximumf>, %39, %cst_20 [1] : vector<8x128xf32> to vector<8xf32>
    %41 = vector.shape_cast %40 : vector<8xf32> to vector<8x1xf32>
    %cst_21 = arith.constant 5.000000e-01 : f32
    %42 = vector.broadcast %cst_21 : f32 to vector<1x128xf32>
    %43 = arith.cmpf ogt, %33, %42 : vector<1x128xf32>
    %44 = vector.shape_cast %43 : vector<1x128xi1> to vector<1x128xi1>
    %45 = vector.broadcast %44 : vector<1x128xi1> to vector<8x128xi1>
    %46 = vector.shape_cast %41 : vector<8x1xf32> to vector<8x1xf32>
    %47 = vector.broadcast %46 : vector<8x1xf32> to vector<8x128xf32>
    %48 = arith.select %45, %47, %32 : vector<8x128xi1>, vector<8x128xf32>
    %49 = vector.extract_strided_slice %15 {offsets = [2, 0], sizes = [1, 128], strides = [1, 1]} : vector<3x128xf32> to vector<1x128xf32>
    %cst_22 = arith.constant 5.000000e-01 : f32
    %50 = vector.broadcast %cst_22 : f32 to vector<1x128xf32>
    %51 = arith.cmpf ogt, %49, %50 : vector<1x128xf32>
    %cst_23 = arith.constant 0xFF800000 : f32
    %52 = vector.shape_cast %51 : vector<1x128xi1> to vector<1x128xi1>
    %53 = vector.broadcast %52 : vector<1x128xi1> to vector<8x128xi1>
    %54 = vector.broadcast %cst_23 : f32 to vector<8x128xf32>
    %55 = arith.select %53, %14, %54 : vector<8x128xi1>, vector<8x128xf32>
    %cst_24 = arith.constant dense<0xFF800000> : vector<8xf32>
    %56 = vector.multi_reduction <maximumf>, %55, %cst_24 [1] : vector<8x128xf32> to vector<8xf32>
    %57 = vector.shape_cast %56 : vector<8xf32> to vector<8x1xf32>
    %cst_25 = arith.constant 5.000000e-01 : f32
    %58 = vector.broadcast %cst_25 : f32 to vector<1x128xf32>
    %59 = arith.cmpf ogt, %49, %58 : vector<1x128xf32>
    %60 = vector.shape_cast %59 : vector<1x128xi1> to vector<1x128xi1>
    %61 = vector.broadcast %60 : vector<1x128xi1> to vector<8x128xi1>
    %62 = vector.shape_cast %57 : vector<8x1xf32> to vector<8x1xf32>
    %63 = vector.broadcast %62 : vector<8x1xf32> to vector<8x128xf32>
    %64 = arith.select %61, %63, %48 : vector<8x128xi1>, vector<8x128xf32>
    %65 = arith.subf %14, %64 : vector<8x128xf32>
    %66 = math.exp %65 : vector<8x128xf32>
    %c0_26 = arith.constant 0 : index
    %c0_27 = arith.constant 0 : index
    %67 = vector.load %arg7[%c0_26, %c0_27] : memref<128x128xf32, #tpu.memory_space<vmem>>, vector<128x128xf32>
    %cst_28 = arith.constant dense<0.000000e+00> : vector<8x128xf32>
    %68 = tpu.matmul %66, %67, %cst_28 {dimension_numbers = #tpu.dot_dimension_numbers<[1], [0], [0], [1], [0, 0, 1, 1], [], []>} : vector<8x128xf32>, vector<128x128xf32>, vector<8x128xf32> -> vector<8x128xf32>
    %69 = tpu.reciprocal %68 {approx = true} : vector<8x128xf32> -> vector<8x128xf32>
    %70 = arith.mulf %68, %69 : vector<8x128xf32>
    %cst_29 = arith.constant 2.000000e+00 : f32
    %71 = vector.broadcast %cst_29 : f32 to vector<8x128xf32>
    %72 = arith.subf %71, %70 : vector<8x128xf32>
    %73 = arith.mulf %69, %72 : vector<8x128xf32>
    %74 = arith.mulf %66, %73 : vector<8x128xf32>
    %c0_30 = arith.constant 0 : index
    %c0_31 = arith.constant 0 : index
    %c0_32 = arith.constant 0 : index
    %75 = vector.load %arg8[%c0_30, %c0_31, %c0_32] : memref<3x128x256xf32, #tpu.memory_space<vmem>>, vector<1x128x256xf32>
    %76 = vector.shape_cast %75 : vector<1x128x256xf32> to vector<128x256xf32>
    %cst_33 = arith.constant dense<0.000000e+00> : vector<8x256xf32>
    %77 = tpu.matmul %74, %76, %cst_33 {dimension_numbers = #tpu.dot_dimension_numbers<[1], [0], [0], [1], [0, 0, 1, 1], [], []>} : vector<8x128xf32>, vector<128x256xf32>, vector<8x256xf32> -> vector<8x256xf32>
    %78 = arith.mulf %13, %77 : vector<8x256xf32>
    %c0_34 = arith.constant 0 : index
    %c0_35 = arith.constant 0 : index
    %c0_36 = arith.constant 0 : index
    %79 = vector.load %arg9[%c0_34, %c0_35, %c0_36] : memref<3x256x128xf32, #tpu.memory_space<vmem>>, vector<1x256x128xf32>
    %80 = vector.shape_cast %79 : vector<1x256x128xf32> to vector<256x128xf32>
    %cst_37 = arith.constant dense<0.000000e+00> : vector<8x128xf32>
    %81 = tpu.matmul %78, %80, %cst_37 {dimension_numbers = #tpu.dot_dimension_numbers<[1], [0], [0], [1], [0, 0, 1, 1], [], []>} : vector<8x256xf32>, vector<256x128xf32>, vector<8x128xf32> -> vector<8x128xf32>
    %c1 = arith.constant 1 : index
    %c0_38 = arith.constant 0 : index
    %c0_39 = arith.constant 0 : index
    %82 = vector.load %arg8[%c1, %c0_38, %c0_39] : memref<3x128x256xf32, #tpu.memory_space<vmem>>, vector<1x128x256xf32>
    %83 = vector.shape_cast %82 : vector<1x128x256xf32> to vector<128x256xf32>
    %cst_40 = arith.constant dense<0.000000e+00> : vector<8x256xf32>
    %84 = tpu.matmul %74, %83, %cst_40 {dimension_numbers = #tpu.dot_dimension_numbers<[1], [0], [0], [1], [0, 0, 1, 1], [], []>} : vector<8x128xf32>, vector<128x256xf32>, vector<8x256xf32> -> vector<8x256xf32>
    %85 = arith.mulf %13, %84 : vector<8x256xf32>
    %c1_41 = arith.constant 1 : index
    %c0_42 = arith.constant 0 : index
    %c0_43 = arith.constant 0 : index
    %86 = vector.load %arg9[%c1_41, %c0_42, %c0_43] : memref<3x256x128xf32, #tpu.memory_space<vmem>>, vector<1x256x128xf32>
    %87 = vector.shape_cast %86 : vector<1x256x128xf32> to vector<256x128xf32>
    %cst_44 = arith.constant dense<0.000000e+00> : vector<8x128xf32>
    %88 = tpu.matmul %85, %87, %cst_44 {dimension_numbers = #tpu.dot_dimension_numbers<[1], [0], [0], [1], [0, 0, 1, 1], [], []>} : vector<8x256xf32>, vector<256x128xf32>, vector<8x128xf32> -> vector<8x128xf32>
    %89 = arith.addf %81, %88 : vector<8x128xf32>
    %c2 = arith.constant 2 : index
    %c0_45 = arith.constant 0 : index
    %c0_46 = arith.constant 0 : index
    %90 = vector.load %arg8[%c2, %c0_45, %c0_46] : memref<3x128x256xf32, #tpu.memory_space<vmem>>, vector<1x128x256xf32>
    %91 = vector.shape_cast %90 : vector<1x128x256xf32> to vector<128x256xf32>
    %cst_47 = arith.constant dense<0.000000e+00> : vector<8x256xf32>
    %92 = tpu.matmul %74, %91, %cst_47 {dimension_numbers = #tpu.dot_dimension_numbers<[1], [0], [0], [1], [0, 0, 1, 1], [], []>} : vector<8x128xf32>, vector<128x256xf32>, vector<8x256xf32> -> vector<8x256xf32>
    %93 = arith.mulf %13, %92 : vector<8x256xf32>
    %c2_48 = arith.constant 2 : index
    %c0_49 = arith.constant 0 : index
    %c0_50 = arith.constant 0 : index
    %94 = vector.load %arg9[%c2_48, %c0_49, %c0_50] : memref<3x256x128xf32, #tpu.memory_space<vmem>>, vector<1x256x128xf32>
    %95 = vector.shape_cast %94 : vector<1x256x128xf32> to vector<256x128xf32>
    %cst_51 = arith.constant dense<0.000000e+00> : vector<8x128xf32>
    %96 = tpu.matmul %93, %95, %cst_51 {dimension_numbers = #tpu.dot_dimension_numbers<[1], [0], [0], [1], [0, 0, 1, 1], [], []>} : vector<8x256xf32>, vector<256x128xf32>, vector<8x128xf32> -> vector<8x128xf32>
    %97 = arith.addf %89, %96 : vector<8x128xf32>
    %c0_52 = arith.constant 0 : index
    %c0_53 = arith.constant 0 : index
    %98 = vector.load %arg10[%c0_52, %c0_53] : memref<8x128xf32, #tpu.memory_space<vmem>>, vector<8x128xf32>
    tpu.vector_store %arg10[%c0_52, %c0_53], %97 {strides = array<i32>} : memref<8x128xf32, #tpu.memory_space<vmem>>, vector<8x128xf32>,
    return
  }
  func.func @transform_0(%arg0: i32) -> (i32, i32) {
    %c0_i32 = arith.constant 0 : i32
    %c0_i32_0 = arith.constant 0 : i32
    return %arg0, %c0_i32 : i32, i32
  }
  func.func @transform_1(%arg0: i32) -> (i32, i32) {
    %c0_i32 = arith.constant 0 : i32
    %c0_i32_0 = arith.constant 0 : i32
    %c0_i32_1 = arith.constant 0 : i32
    return %c0_i32, %c0_i32_0 : i32, i32
  }
  func.func @transform_2(%arg0: i32) -> (i32, i32) {
    %c0_i32 = arith.constant 0 : i32
    %c0_i32_0 = arith.constant 0 : i32
    %c0_i32_1 = arith.constant 0 : i32
    return %c0_i32, %c0_i32_0 : i32, i32
  }
  func.func @transform_3(%arg0: i32) -> (i32, i32) {
    %c0_i32 = arith.constant 0 : i32
    %c0_i32_0 = arith.constant 0 : i32
    %c0_i32_1 = arith.constant 0 : i32
    return %c0_i32, %c0_i32_0 : i32, i32
  }
  func.func @transform_4(%arg0: i32) -> (i32, i32) {
    %c0_i32 = arith.constant 0 : i32
    %c0_i32_0 = arith.constant 0 : i32
    %c0_i32_1 = arith.constant 0 : i32
    return %c0_i32, %c0_i32_0 : i32, i32
  }
  func.func @transform_5(%arg0: i32) -> (i32, i32) {
    %c0_i32 = arith.constant 0 : i32
    %c0_i32_0 = arith.constant 0 : i32
    %c0_i32_1 = arith.constant 0 : i32
    return %c0_i32, %c0_i32_0 : i32, i32
  }
  func.func @transform_6(%arg0: i32) -> (i32, i32) {
    %c0_i32 = arith.constant 0 : i32
    %c0_i32_0 = arith.constant 0 : i32
    %c0_i32_1 = arith.constant 0 : i32
    return %c0_i32, %c0_i32_0 : i32, i32
  }
  func.func @transform_7(%arg0: i32) -> (i32, i32, i32) {
    %c0_i32 = arith.constant 0 : i32
    %c0_i32_0 = arith.constant 0 : i32
    %c0_i32_1 = arith.constant 0 : i32
    %c0_i32_2 = arith.constant 0 : i32
    return %c0_i32, %c0_i32_0, %c0_i32_1 : i32, i32, i32
  }
  func.func @transform_8(%arg0: i32) -> (i32, i32, i32) {
    %c0_i32 = arith.constant 0 : i32
    %c0_i32_0 = arith.constant 0 : i32
    %c0_i32_1 = arith.constant 0 : i32
    %c0_i32_2 = arith.constant 0 : i32
    return %c0_i32, %c0_i32_0, %c0_i32_1 : i32, i32, i32
  }
  func.func @transform_9(%arg0: i32) -> (i32, i32) {
    %c0_i32 = arith.constant 0 : i32
    %c0_i32_0 = arith.constant 0 : i32
    return %arg0, %c0_i32 : i32, i32
  }
}

</mosaic_0001>

<bundles_post_ra>
// kernel: tpu_custom_call.1
= control target key start
LH: loop header
LB: loop body
LE: loop exit
PB: predicated region body
PF: predicated region fallthrough
CT: control target
= control target key end

     0   :  { %14 = vsyncpa [#allocation3], 0  ;;  %s1652_s0 = inlined_call_operand.hbm [shape: f32[8,96], index: 0, kind: input, shape index: {}]   ;;  %s1653_s1 = inlined_call_operand.hbm [shape: f32[96,256], index: 1, kind: input, shape index: {}]   ;;  %s1654_s2 = inlined_call_operand.vmem [shape: f32[1,256], index: 2, kind: input, shape index: {}]   ;;  %s1655_s3 = inlined_call_operand.hbm [shape: f32[128,256], index: 3, kind: input, shape index: {}]   ;;  %s1656_s4 = inlined_call_operand.hbm [shape: f32[1,256], index: 4, kind: input, shape index: {}]   ;;  %s1657_s5 = inlined_call_operand.vmem [shape: f32[3,128], index: 5, kind: input, shape index: {}]   ;;  %s1658_s6 = inlined_call_operand.hbm [shape: f32[128,128], index: 6, kind: input, shape index: {}]   ;;  %s1659_s7 = inlined_call_operand.hbm [shape: f32[3,128,256], index: 7, kind: input, shape index: {}]   ;;  %s1660_s8 = inlined_call_operand.hbm [shape: f32[3,256,128], index: 8, kind: input, shape index: {}]   ;;  %s1661_s9 = inlined_call_operand.hbm [shape: f32[8,128], index: 9, kind: output, shape index: {}]  }
   0x1   :  { %15 = vsyncpa [#allocation6], 0 }
   0x2   :  { %16 = vsyncpa [#allocation9], 0 }
   0x3   :  { %17 = vsyncpa [#allocation12], 0 }
   0x4   :  { %18 = vsyncpa [#allocation4], 0  ;;  %s1468_s30 = smov [#allocation5]  }
   0x5   :  { %s34_s10 = sshll.u32 %s1468_s30, 4  ;;  %s35_s10 = int_to_ptr.vmem [resolvable:$true] %s34_s10 }
   0x6   :  { %s1306_s11 = scalar_lea.vmem %s35_s10, 3072  ;;  %p1311_p1 = scmp.lt.s32.totalorder %s35_s10, %s35_s10 }
   0x7   :  { %p1307_p0 = scmp.ne.s32.totalorder %s35_s10, %s1306_s11  ;;  %p1312_p2 = scmp.lt.s32.totalorder %s1306_s11, %s1306_s11 }
   0x9   :  { %p1313_p3 = por %p1312_p2, %p1311_p1 }
   0xb   :  { %p1314_p4 = pnand %p1313_p3, %p1307_p0 }
   0xd   :  { %1317 = shalt.err (!%p1314_p4)
}
   0xe   :  { %s1469_s12 = smov 256   ;;  %s1470_s13 = smov 16  }
   0xf   :  { %40 = dma.hbm_to_vmem [thread:$0]  %s1653_s1, 3072, %s35_s10, [#allocation6], %s1469_s12, %s1469_s12, %s1470_s13  }
  0x10   :  { %s1471_s16 = smov [#allocation8]   ;;  %s1472_s18 = smov [#allocation11]  }
  0x11   :  { %s61_s17 = sshll.u32 %s1471_s16, 4  ;;  %s84_s19 = sshll.u32 %s1472_s18, 4  ;;  %s62_s17 = int_to_ptr.vmem [resolvable:$true] %s61_s17  ;;  %s85_s19 = int_to_ptr.vmem [resolvable:$true] %s84_s19 }
  0x12   :  { %s1326_s20 = scalar_lea.vmem %s62_s17, 32  ;;  %p1331_p6 = scmp.lt.s32.totalorder %s62_s17, %s62_s17 }
  0x13   :  { %p1327_p5 = scmp.ne.s32.totalorder %s62_s17, %s1326_s20  ;;  %p1332_p7 = scmp.lt.s32.totalorder %s1326_s20, %s1326_s20 }
  0x15   :  { %p1333_p8 = por %p1332_p7, %p1331_p6 }
  0x17   :  { %p1334_p9 = pnand %p1333_p8, %p1327_p5 }
  0x19   :  { %1337 = shalt.err (!%p1334_p9)
}
  0x1a   :  { %64 = dma.hbm_to_vmem [thread:$0]  %s1656_s4, 32, %s62_s17, [#allocation9]  }
  0x1b   :  { %s1346_s23 = scalar_lea.vmem %s85_s19, 12288  ;;  %p1351_p11 = scmp.lt.s32.totalorder %s85_s19, %s85_s19 }
  0x1c   :  { %p1347_p10 = scmp.ne.s32.totalorder %s85_s19, %s1346_s23  ;;  %p1352_p12 = scmp.lt.s32.totalorder %s1346_s23, %s1346_s23 }
  0x1e   :  { %p1353_p13 = por %p1352_p12, %p1351_p11 }
  0x20   :  { %p1354_p0 = pnand %p1353_p13, %p1347_p10 }
  0x22   :  { %1357 = shalt.err (!%p1354_p0)
}
  0x23   :  { %90 = dma.hbm_to_vmem [thread:$0]  %s1659_s7, 12288, %s85_s19, [#allocation12], %s1469_s12, %s1469_s12, %s1470_s13  }
  0x24   :  { %s1473_s25 = smov [#allocation2]   ;;  %s1474_s27 = smov [#allocation7]  }
  0x25   :  { %s25_s26 = sshll.u32 %s1473_s25, 4  ;;  %s48_s4 = sshll.u32 %s1474_s27, 4  ;;  %s26_s26 = int_to_ptr.vmem [resolvable:$true] %s25_s26  ;;  %s49_s4 = int_to_ptr.vmem [resolvable:$true] %s48_s4 }
  0x26   :  { %s1366_s28 = scalar_lea.vmem %s26_s26, 128  ;;  %p1371_p2 = scmp.lt.s32.totalorder %s26_s26, %s26_s26 }
  0x27   :  { %p1367_p1 = scmp.ne.s32.totalorder %s26_s26, %s1366_s28  ;;  %p1372_p3 = scmp.lt.s32.totalorder %s1366_s28, %s1366_s28 }
  0x29   :  { %p1373_p4 = por %p1372_p3, %p1371_p2 }
  0x2b   :  { %p1374_p5 = pnand %p1373_p4, %p1367_p1 }
  0x2d   :  { %1377 = shalt.err (!%p1374_p5)
}
  0x2e   :  { %28 = dma.hbm_to_vmem [thread:$0]  %s1652_s0, 128, %s26_s26, [#allocation3]  }
  0x2f   :  { %s1386_s10 = scalar_lea.vmem %s49_s4, 4096  ;;  %p1391_p7 = scmp.lt.s32.totalorder %s49_s4, %s49_s4 }
  0x30   :  { %p1387_p6 = scmp.ne.s32.totalorder %s49_s4, %s1386_s10  ;;  %p1392_p8 = scmp.lt.s32.totalorder %s1386_s10, %s1386_s10 }
  0x32   :  { %p1393_p9 = por %p1392_p8, %p1391_p7 }
  0x34   :  { %p1394_p10 = pnand %p1393_p9, %p1387_p6 }
  0x36   :  { %1397 = shalt.err (!%p1394_p10)
}
  0x37   :  { %54 = dma.hbm_to_vmem [thread:$0]  %s1655_s3, 4096, %s49_s4, [#allocation6], %s1469_s12, %s1469_s12, %s1470_s13  }
  0x38   :  { %s1475_s14 = smov [#allocation10]  }
  0x39   :  { %s72_s15 = sshll.u32 %s1475_s14, 4  ;;  %s73_s15 = int_to_ptr.vmem [resolvable:$true] %s72_s15 }
  0x3a   :  { %s1406_s16 = scalar_lea.vmem %s73_s15, 2048  ;;  %p1411_p12 = scmp.lt.s32.totalorder %s73_s15, %s73_s15 }
  0x3b   :  { %p1407_p11 = scmp.ne.s32.totalorder %s73_s15, %s1406_s16  ;;  %p1412_p13 = scmp.lt.s32.totalorder %s1406_s16, %s1406_s16 }
  0x3d   :  { %p1413_p0 = por %p1412_p13, %p1411_p12 }
  0x3f   :  { %p1414_p1 = pnand %p1413_p0, %p1407_p11 }
  0x41   :  { %1417 = shalt.err (!%p1414_p1)
}
  0x42   :  { %s1476_s0 = smov 128   ;;  %s1477_s17 = smov 8  }
  0x43   :  { %78 = dma.hbm_to_vmem [thread:$0]  %s1658_s6, 2048, %s73_s15, [#allocation9], %s1476_s0, %s1476_s0, %s1477_s17  }
  0x44   :  { %s1478_s20 = smov [#allocation13]  }
  0x45   :  { %s96_s21 = sshll.u32 %s1478_s20, 4  ;;  %s97_s21 = int_to_ptr.vmem [resolvable:$true] %s96_s21 }
  0x46   :  { %s1426_s3 = scalar_lea.vmem %s97_s21, 12288  ;;  %p1431_p3 = scmp.lt.s32.totalorder %s97_s21, %s97_s21 }
  0x47   :  { %p1427_p2 = scmp.ne.s32.totalorder %s97_s21, %s1426_s3  ;;  %p1432_p4 = scmp.lt.s32.totalorder %s1426_s3, %s1426_s3 }
  0x49   :  { %p1433_p5 = por %p1432_p4, %p1431_p3 }
  0x4b   :  { %p1434_p6 = pnand %p1433_p5, %p1427_p2 }
  0x4d   :  { %1437 = shalt.err (!%p1434_p6)
}
  0x4e   :  { %102 = dma.hbm_to_vmem [thread:$0]  %s1660_s8, 12288, %s97_s21, [#allocation12], %s1476_s0, %s1476_s0, %s1477_s17  }
  0x4f   :  { %1458 = dma.done.wait [#allocation3], 128  }
  0x50   :  { %1459 = vsyncadd [#allocation3], 4294967168 }
  0x51   :  { %1460 = dma.done.wait [#allocation6], 7168  }
  0x52   :  { %1461 = vsyncadd [#allocation6], 4294960128 }
  0x53   :  { %1462 = dma.done.wait [#allocation9], 2080  }
  0x54   :  { %1463 = vsyncadd [#allocation9], 4294965216 }
  0x55   :  { %1464 = dma.done.wait [#allocation12], 24576  }
  0x56   :  { %1465 = vsyncadd [#allocation12], 4294942720  ;;  %v1479_v0 = vmov 0.0   ;;  %v148_v1 = vld [vmem:[#allocation5 + $0xb8] sm:$0xff]  ;;  %v147_v2 = vld [vmem:[#allocation5 + $0xb0] sm:$0xff]  ;;  %vm161_vm0 = vcmask 785408   ;;  %v151_v62 = vlaneseq }
  0x57   :  { %229 = vmatprep.mubr.f32.mxu0 %v1479_v0  ;;  %345 = vmatprep.mubr.f32.mxu1 %v1479_v0  ;;  %v146_v3 = vld [vmem:[#allocation5 + $0xa8] sm:$0xff]  ;;  %v145_v4 = vld [vmem:[#allocation5 + $0xa0] sm:$0xff]  ;;  %v144_v5 = vld [vmem:[#allocation5 + $0x98] sm:$0xff]  ;;  %vm1481_vm5 = vmmov 0  }
  0x58   :  { %173 = vmatprep.subr.mxu0 %v148_v1  ;;  %v143_v6 = vld [vmem:[#allocation5 + $0x90] sm:$0xff]  ;;  %v142_v7 = vld [vmem:[#allocation5 + $0x88] sm:$0xff]  ;;  %v141_v8 = vld [vmem:[#allocation5 + $0x80] sm:$0xff]  ;;  %v152_v63 = vshrl.u32 %v151_v62, 7 }
  0x59   :  { %174 = vmatpush1.msra.mxu0 %v147_v2  ;;  %v140_v9 = vld [vmem:[#allocation5 + $0x78] sm:$0xff]  ;;  %v139_v10 = vld [vmem:[#allocation5 + $0x70] sm:$0xff]  ;;  %v138_v11 = vld [vmem:[#allocation5 + $0x68] sm:$0xff] }
  0x5a   :  { %175 = vmatprep.subr.mxu0 %v146_v3  ;;  %v268_v12 = vld [vmem:[#allocation7 + $0xf8] sm:$0xff]  ;;  %v267_v13 = vld [vmem:[#allocation7 + $0xf0] sm:$0xff]  ;;  %v137_v14 = vld [vmem:[#allocation5 + $0x60] sm:$0xff]  ;;  %v1573_v2 = vsub.s32 0, %v152_v63 }
  0x5b   :  { %176 = vmatpush1.msra.mxu0 %v145_v4  ;;  %281 = vmatprep.subr.mxu1 %v268_v12  ;;  %v266_v15 = vld [vmem:[#allocation7 + $0xe8] sm:$0xff]  ;;  %v265_v16 = vld [vmem:[#allocation7 + $0xe0] sm:$0xff]  ;;  %v136_v17 = vld [vmem:[#allocation5 + $0x58] sm:$0xff]  ;;  %v375_v4 = vsub.s32 2, %v152_v63 }
  0x5c   :  { %177 = vmatprep.subr.mxu0 %v144_v5  ;;  %282 = vmatpush1.msra.mxu1 %v267_v13  ;;  %v264_v18 = vld [vmem:[#allocation7 + $0xd8] sm:$0xff]  ;;  %v135_v19 = vld [vmem:[#allocation5 + $0x50] sm:$0xff]  ;;  %v134_v21 = vld [vmem:[#allocation5 + $0x48] sm:$0xff]  ;;  %v1578_v5 = vsub.s32 1, %v152_v63 }
  0x5d   :  { %178 = vmatpush1.msra.mxu0 %v143_v6  ;;  %283 = vmatprep.subr.mxu1 %v266_v15  ;;  %v263_v20 = vld [vmem:[#allocation7 + $0xd0] sm:$0xff]  ;;  %v262_v22 = vld [vmem:[#allocation7 + $0xc8] sm:$0xff]  ;;  %v133_v23 = vld [vmem:[#allocation5 + $0x40] sm:$0xff]  ;;  %v1480_v6 = vmov 0  }
  0x5e   :  { %179 = vmatprep.subr.mxu0 %v142_v7  ;;  %284 = vmatpush1.msra.mxu1 %v265_v16  ;;  %v261_v24 = vld [vmem:[#allocation7 + $0xc0] sm:$0xff]  ;;  %v132_v25 = vld [vmem:[#allocation5 + $0x38] sm:$0xff]  ;;  %v131_v27 = vld [vmem:[#allocation5 + $0x30] sm:$0xff] }
  0x5f   :  { %180 = vmatpush1.msra.mxu0 %v141_v8  ;;  %285 = vmatprep.subr.mxu1 %v264_v18  ;;  %v260_v26 = vld [vmem:[#allocation7 + $0xb8] sm:$0xff]  ;;  %v259_v28 = vld [vmem:[#allocation7 + $0xb0] sm:$0xff]  ;;  %v130_v29 = vld [vmem:[#allocation5 + $0x28] sm:$0xff] }
  0x60   :  { %181 = vmatprep.subr.mxu0 %v140_v9  ;;  %286 = vmatpush1.msra.mxu1 %v263_v20  ;;  %v258_v30 = vld [vmem:[#allocation7 + $0xa8] sm:$0xff]  ;;  %v129_v31 = vld [vmem:[#allocation5 + $0x20] sm:$0xff]  ;;  %v128_v33 = vld [vmem:[#allocation5 + $0x18] sm:$0xff] }
  0x61   :  { %182 = vmatpush1.msra.mxu0 %v139_v10  ;;  %287 = vmatprep.subr.mxu1 %v262_v22  ;;  %v257_v32 = vld [vmem:[#allocation7 + $0xa0] sm:$0xff]  ;;  %v256_v34 = vld [vmem:[#allocation7 + $0x98] sm:$0xff]  ;;  %v127_v35 = vld [vmem:[#allocation5 + $0x10] sm:$0xff] }
  0x62   :  { %183 = vmatprep.subr.mxu0 %v138_v11  ;;  %288 = vmatpush1.msra.mxu1 %v261_v24  ;;  %v255_v36 = vld [vmem:[#allocation7 + $0x90] sm:$0xff]  ;;  %v126_v37 = vld [vmem:[#allocation5 + $0x8] sm:$0xff]  ;;  %v125_v39 = vld [vmem:[#allocation5] sm:$0xff] }
  0x63   :  { %184 = vmatpush1.msra.mxu0 %v137_v14  ;;  %289 = vmatprep.subr.mxu1 %v260_v26  ;;  %v254_v38 = vld [vmem:[#allocation7 + $0x88] sm:$0xff]  ;;  %v253_v40 = vld [vmem:[#allocation7 + $0x80] sm:$0xff]  ;;  %v124_v41 = vld [vmem:[#allocation2] sm:$0xff] }
  0x64   :  { %185 = vmatprep.subr.mxu0 %v136_v17  ;;  %290 = vmatpush1.msra.mxu1 %v259_v28  ;;  %v252_v42 = vld [vmem:[#allocation7 + $0x78] sm:$0xff]  ;;  %v251_v43 = vld [vmem:[#allocation7 + $0x70] sm:$0xff]  ;;  %v250_v44 = vld [vmem:[#allocation7 + $0x68] sm:$0xff] }
  0x65   :  { %186 = vmatpush1.msra.mxu0 %v135_v19  ;;  %291 = vmatprep.subr.mxu1 %v258_v30  ;;  %v249_v45 = vld [vmem:[#allocation7 + $0x60] sm:$0xff]  ;;  %v248_v46 = vld [vmem:[#allocation7 + $0x58] sm:$0xff]  ;;  %v247_v47 = vld [vmem:[#allocation7 + $0x50] sm:$0xff] }
  0x66   :  { %187 = vmatprep.subr.mxu0 %v134_v21  ;;  %292 = vmatpush1.msra.mxu1 %v257_v32  ;;  %v246_v48 = vld [vmem:[#allocation7 + $0x48] sm:$0xff]  ;;  %v245_v49 = vld [vmem:[#allocation7 + $0x40] sm:$0xff]  ;;  %v244_v50 = vld [vmem:[#allocation7 + $0x38] sm:$0xff] }
  0x67   :  { %188 = vmatpush1.msra.mxu0 %v133_v23  ;;  %293 = vmatprep.subr.mxu1 %v256_v34  ;;  %v243_v51 = vld [vmem:[#allocation7 + $0x30] sm:$0xff]  ;;  %v242_v52 = vld [vmem:[#allocation7 + $0x28] sm:$0xff]  ;;  %v241_v53 = vld [vmem:[#allocation7 + $0x20] sm:$0xff] }
  0x68   :  { %189 = vmatprep.subr.mxu0 %v132_v25  ;;  %294 = vmatpush1.msra.mxu1 %v255_v36  ;;  %v240_v54 = vld [vmem:[#allocation7 + $0x18] sm:$0xff]  ;;  %v239_v55 = vld [vmem:[#allocation7 + $0x10] sm:$0xff]  ;;  %v238_v56 = vld [vmem:[#allocation7 + $0x8] sm:$0xff] }
  0x69   :  { %190 = vmatpush1.msra.mxu0 %v131_v27  ;;  %295 = vmatprep.subr.mxu1 %v254_v38  ;;  %v237_v57 = vld [vmem:[#allocation7] sm:$0xff]  ;;  %v399_v59 = vld [vmem:[#allocation10 + $0x70] sm:$0xff]  ;;  %v398_v60 = vld [vmem:[#allocation10 + $0x68] sm:$0xff] }
  0x6a   :  { %191 = vmatprep.subr.mxu0 %v130_v29  ;;  %296 = vmatpush1.msra.mxu1 %v253_v40  ;;  %v400_v58 = vld [vmem:[#allocation10 + $0x78] sm:$0xff]  ;;  %v397_v61 = vld [vmem:[#allocation10 + $0x60] sm:$0xff]  ;;  %v149_v3 = vld [vmem:[%s1654_s2] sm:$0x3]  ;;  %s1482_s2 = smov [#allocation14]  }
  0x6b   :  { %192 = vmatpush1.msra.mxu0 %v129_v31  ;;  %297 = vmatprep.subr.mxu1 %v252_v42  ;;  %v352_v1 = vld [vmem:[%s1657_s5] sm:$0x7]  ;;  %v154_v8 = vrot.slane %v149_v3, %v1573_v2  ;;  %v158_v11 = vrot.slane %v149_v3, %v1578_v5  ;;  %v394_v25 = vld [vmem:[#allocation10 + $0x48] sm:$0xff]  ;;  %v393_v26 = vld [vmem:[#allocation10 + $0x40] sm:$0xff]  ;;  %s1109_s5 = sshll.u32 %s1482_s2, 4  ;;  %s1110_s5 = int_to_ptr.vmem [resolvable:$true] %s1109_s5 }
  0x6c   :  { %193 = vmatprep.subr.mxu0 %v128_v33  ;;  %298 = vmatpush1.msra.mxu1 %v251_v43  ;;  %vm353_vm1 = vcmp.gt.f32.partialorder %v352_v1, 0.5  ;;  %v396_v23 = vld [vmem:[#allocation10 + $0x58] sm:$0xff]  ;;  %v395_v24 = vld [vmem:[#allocation10 + $0x50] sm:$0xff]  ;;  %v390_v29 = vld [vmem:[#allocation10 + $0x28] sm:$0xff]  ;;  %s1438_s1 = scalar_lea.vmem %s1110_s5, 128  ;;  %p1443_p8 = scmp.lt.s32.totalorder %s1110_s5, %s1110_s5 }
  0x6d   :  { %194 = vmatpush1.msra.mxu0 %v127_v35  ;;  %299 = vmatprep.subr.mxu1 %v250_v44  ;;  %v354_v7 = vsel %vm353_vm1, 1, %v1480_v6  ;;  %v392_v27 = vld [vmem:[#allocation10 + $0x38] sm:$0xff]  ;;  %v391_v28 = vld [vmem:[#allocation10 + $0x30] sm:$0xff]  ;;  %v389_v30 = vld [vmem:[#allocation10 + $0x20] sm:$0xff]  ;;  %p1439_p7 = scmp.ne.s32.totalorder %s1110_s5, %s1438_s1  ;;  %p1444_p9 = scmp.lt.s32.totalorder %s1438_s1, %s1438_s1 }
  0x6e   :  { %195 = vmatprep.subr.mxu0 %v126_v37  ;;  %300 = vmatpush1.msra.mxu1 %v249_v45  ;;  %v1581_v9 = vrot.slane %v354_v7, %v375_v4  ;;  %v358_v10 = vrot.slane %v354_v7, %v1573_v2  ;;  %v367_v16 = vrot.slane %v354_v7, %v1578_v5  ;;  %v388_v31 = vld [vmem:[#allocation10 + $0x18] sm:$0xff]  ;;  %v387_v32 = vld [vmem:[#allocation10 + $0x10] sm:$0xff]  ;;  %v386_v33 = vld [vmem:[#allocation10 + $0x8] sm:$0xff] }
  0x6f   :  { %196 = vmatpush1.msra.mxu0 %v125_v39  ;;  %301 = vmatprep.subr.mxu1 %v248_v46  ;;  %v385_v34 = vld [vmem:[#allocation10] sm:$0xff]  ;;  %v507_v35 = vld [vmem:[#allocation11 + $0xf8] sm:$0xff]  ;;  %v506_v37 = vld [vmem:[#allocation11 + $0xf0] sm:$0xff]  ;;  %p1445_p10 = por %p1444_p9, %p1443_p8 }
  0x70   :  { %1121 = vmatmul.mubr.msk.f32.vlgmr.msra.gmra.mxu0 %vm161_vm0, %v124_v41  ;;  %1244 = vmatprep.subr.mxu0 %v1479_v0  ;;  %vm377_vm2 = vcmp.eq.s32.totalorder %v1581_v9, 1  ;;  %vm1586_vm3 = vcmp.eq.s32.totalorder %v358_v10, 1  ;;  %vm1599_vm4 = vcmp.eq.s32.totalorder %v367_v16, 1  ;;  %v645_v36 = vld [vmem:[#allocation11 + $0x1f8] sm:$0xff]  ;;  %v505_v38 = vld [vmem:[#allocation11 + $0xe8] sm:$0xff]  ;;  %v504_v39 = vld [vmem:[#allocation11 + $0xe0] sm:$0xff] }
  0x71   :  { %302 = vmatpush1.msra.mxu1 %v247_v47  ;;  %1245 = vmatpush3.msra.mxu0 %v400_v58  ;;  %v503_v40 = vld [vmem:[#allocation11 + $0xd8] sm:$0xff]  ;;  %v502_v41 = vld [vmem:[#allocation11 + $0xd0] sm:$0xff]  ;;  %v501_v42 = vld [vmem:[#allocation11 + $0xc8] sm:$0xff]  ;;  %p1446_p11 = pnand %p1445_p10, %p1439_p7 }
  0x72   :  { %303 = vmatprep.subr.mxu1 %v246_v48  ;;  %1246 = vmatprep.subr.mxu0 %v1479_v0  ;;  %v500_v43 = vld [vmem:[#allocation11 + $0xc0] sm:$0xff]  ;;  %v499_v44 = vld [vmem:[#allocation11 + $0xb8] sm:$0xff]  ;;  %v640_v58 = vld [vmem:[#allocation11 + $0x1d0] sm:$0xff] }
  0x73   :  { %304 = vmatpush1.msra.mxu1 %v245_v49  ;;  %1247 = vmatpush3.msra.mxu0 %v399_v59  ;;  %v639_v59 = vld [vmem:[#allocation11 + $0x1c8] sm:$0xff]  ;;  %v498_v62 = vld [vmem:[#allocation11 + $0xb0] sm:$0xff]  ;;  %v496_v4 = vld [vmem:[#allocation11 + $0xa0] sm:$0xff] }
  0x74   :  { %305 = vmatprep.subr.mxu1 %v244_v50  ;;  %1248 = vmatprep.subr.mxu0 %v1479_v0  ;;  %v636_v63 = vld [vmem:[#allocation11 + $0x1b0] sm:$0xff]  ;;  %v497_v1 = vld [vmem:[#allocation11 + $0xa8] sm:$0xff]  ;;  %v634_v6 = vld [vmem:[#allocation11 + $0x1a0] sm:$0xff] }
  0x75   :  { %306 = vmatpush1.msra.mxu1 %v243_v51  ;;  %1249 = vmatpush3.msra.mxu0 %v398_v60  ;;  %v638_v60 = vld [vmem:[#allocation11 + $0x1c0] sm:$0xff]  ;;  %v635_v3 = vld [vmem:[#allocation11 + $0x1a8] sm:$0xff]  ;;  %v495_v7 = vld [vmem:[#allocation11 + $0x98] sm:$0xff] }
  0x76   :  { %307 = vmatprep.subr.mxu1 %v242_v52  ;;  %1250 = vmatprep.subr.mxu0 %v1479_v0  ;;  %v494_v9 = vld [vmem:[#allocation11 + $0x90] sm:$0xff]  ;;  %v491_v15 = vld [vmem:[#allocation11 + $0x78] sm:$0xff]  ;;  %v488_v21 = vld [vmem:[#allocation11 + $0x60] sm:$0xff] }
  0x77   :  { %308 = vmatpush1.msra.mxu1 %v241_v53  ;;  %1251 = vmatpush3.msra.mxu0 %v397_v61  ;;  %v644_v53 = vld [vmem:[#allocation11 + $0x1f0] sm:$0xff]  ;;  %v637_v61 = vld [vmem:[#allocation11 + $0x1b8] sm:$0xff] }
  0x78   :  { %309 = vmatprep.subr.mxu1 %v240_v54  ;;  %1252 = vmatprep.subr.mxu0 %v1479_v0  ;;  %v632_v10 = vld [vmem:[#allocation11 + $0x190] sm:$0xff]  ;;  %v629_v16 = vld [vmem:[#allocation11 + $0x178] sm:$0xff] }
  0x79   :  { %310 = vmatpush1.msra.mxu1 %v239_v55  ;;  %1253 = vmatpush3.msra.mxu0 %v396_v23  ;;  %v643_v55 = vld [vmem:[#allocation11 + $0x1e8] sm:$0xff]  ;;  %v487_v23 = vld [vmem:[#allocation11 + $0x58] sm:$0xff] }
  0x7a   :  { %311 = vmatprep.subr.mxu1 %v238_v56  ;;  %1254 = vmatprep.subr.mxu0 %v1479_v0  ;;  %v642_v56 = vld [vmem:[#allocation11 + $0x1e0] sm:$0xff] }
  0x7b   :  { %312 = vmatpush1.msra.mxu1 %v237_v57  ;;  %1255 = vmatpush3.msra.mxu0 %v395_v24  ;;  %v641_v57 = vld [vmem:[#allocation11 + $0x1d8] sm:$0xff] }
  0x7c   :  { %1256 = vmatprep.subr.mxu0 %v1479_v0  ;;  %1276 = vmatprep.mubr.msk.f32.mxu0 %vm1481_vm5, %v1479_v0  ;;  %v625_v24 = vld [vmem:[#allocation11 + $0x158] sm:$0xff] }
  0x7d   :  { %1257 = vmatpush3.msra.mxu0 %v394_v25  ;;  %508 = vmatprep.subr.mxu1 %v507_v35  ;;  %v486_v25 = vld [vmem:[#allocation11 + $0x50] sm:$0xff]  ;;  %v481_v35 = vld [vmem:[#allocation11 + $0x28] sm:$0xff] }
  0x7e   :  { %1258 = vmatprep.subr.mxu0 %v1479_v0 }
  0x7f   :  { %1259 = vmatpush3.msra.mxu0 %v393_v26  ;;  %v624_v26 = vld [vmem:[#allocation11 + $0x150] sm:$0xff] }
  0x80   :  { %1260 = vmatprep.subr.mxu0 %v1479_v0 }
  0x81   :  { %1261 = vmatpush3.msra.mxu0 %v392_v27  ;;  %v485_v27 = vld [vmem:[#allocation11 + $0x48] sm:$0xff] }
  0x82   :  { %1262 = vmatprep.subr.mxu0 %v1479_v0 }
  0x83   :  { %1263 = vmatpush3.msra.mxu0 %v391_v28  ;;  %v623_v28 = vld [vmem:[#allocation11 + $0x148] sm:$0xff] }
  0x84   :  { %1264 = vmatprep.subr.mxu0 %v1479_v0 }
  0x85   :  { %1265 = vmatpush3.msra.mxu0 %v390_v29  ;;  %v484_v29 = vld [vmem:[#allocation11 + $0x40] sm:$0xff] }
  0x86   :  { %1266 = vmatprep.subr.mxu0 %v1479_v0 }
  0x87   :  { %1267 = vmatpush3.msra.mxu0 %v389_v30  ;;  %v622_v30 = vld [vmem:[#allocation11 + $0x140] sm:$0xff] }
  0x88   :  { %1268 = vmatprep.subr.mxu0 %v1479_v0 }
  0x89   :  { %1269 = vmatpush3.msra.mxu0 %v388_v31  ;;  %v483_v31 = vld [vmem:[#allocation11 + $0x38] sm:$0xff] }
  0x8a   :  { %1270 = vmatprep.subr.mxu0 %v1479_v0 }
  0x8b   :  { %1271 = vmatpush3.msra.mxu0 %v387_v32  ;;  %v621_v32 = vld [vmem:[#allocation11 + $0x138] sm:$0xff] }
  0x8c   :  { %1272 = vmatprep.subr.mxu0 %v1479_v0 }
  0x8d   :  { %1273 = vmatpush3.msra.mxu0 %v386_v33  ;;  %v482_v33 = vld [vmem:[#allocation11 + $0x30] sm:$0xff] }
  0x8e   :  { %1274 = vmatprep.subr.mxu0 %v1479_v0 }
  0x8f   :  { %1275 = vmatpush3.msra.mxu0 %v385_v34  ;;  %v620_v34 = vld [vmem:[#allocation11 + $0x130] sm:$0xff] }
  0x90   :  { %646 = vmatprep.subr.mxu0 %v645_v36  ;;  %v619_v36 = vld [vmem:[#allocation11 + $0x128] sm:$0xff] }
 0x130   :  { %v231_v12 = vpop.f32.mrf.mxu0 }
 0x131   :  { %v232_v13 = vadd.f32 %v231_v12, %v154_v8  ;;  %v633_v8 = vld [vmem:[#allocation11 + $0x198] sm:$0xff]  ;;  %v631_v12 = vld [vmem:[#allocation11 + $0x188] sm:$0xff] }
 0x132   :  { %v233_v14 = vpop.f32.mrf.mxu0 }
 0x133   :  { %v236_v17 = vmax.f32 %v232_v13, 0.0  ;;  %v1591_v18 = vadd.f32 %v233_v14, %v158_v11  ;;  %v493_v11 = vld [vmem:[#allocation11 + $0x88] sm:$0xff]  ;;  %v492_v13 = vld [vmem:[#allocation11 + $0x80] sm:$0xff] }
 0x134   :  { %v630_v14 = vld [vmem:[#allocation11 + $0x180] sm:$0xff] }
 0x135   :  { %346 = vmatmul.mubr.f32.vlgmr.msra.gmra.mxu1 %v236_v17  ;;  %v378_v19 = vsel %vm377_vm2, %v1591_v18, -inf  ;;  %v360_v20 = vsel %vm1586_vm3, %v1591_v18, -inf  ;;  %v369_v22 = vsel %vm1599_vm4, %v1591_v18, -inf  ;;  %v490_v17 = vld [vmem:[#allocation11 + $0x70] sm:$0xff] }
 0x136   :  { %379 = vmax.xlane.f32.xlu1 %v378_v19  ;;  %361 = vmax.xlane.f32.xlu0 %v360_v20  ;;  %v489_v19 = vld [vmem:[#allocation11 + $0x68] sm:$0xff] }
 0x137   :  { %572 = vmatprep.mubr.f32.mxu1 %v1479_v0  ;;  %509 = vmatpush1.msra.mxu1 %v506_v37  ;;  %v627_v20 = vld [vmem:[#allocation11 + $0x168] sm:$0xff]  ;;  %v480_v37 = vld [vmem:[#allocation11 + $0x20] sm:$0xff] }
 0x138   :  { %510 = vmatprep.subr.mxu1 %v505_v38  ;;  %v618_v38 = vld [vmem:[#allocation11 + $0x120] sm:$0xff] }
 0x139   :  { %511 = vmatpush1.msra.mxu1 %v504_v39  ;;  %v479_v39 = vld [vmem:[#allocation11 + $0x18] sm:$0xff] }
 0x13a   :  { %370 = vmax.xlane.f32.xlu0 %v369_v22  ;;  %512 = vmatprep.subr.mxu1 %v503_v40  ;;  %v626_v22 = vld [vmem:[#allocation11 + $0x160] sm:$0xff]  ;;  %v617_v40 = vld [vmem:[#allocation11 + $0x118] sm:$0xff] }
 0x13b   :  { %513 = vmatpush1.msra.mxu1 %v502_v41  ;;  %v478_v41 = vld [vmem:[#allocation11 + $0x10] sm:$0xff] }
 0x13c   :  { %514 = vmatprep.subr.mxu1 %v501_v42  ;;  %v616_v42 = vld [vmem:[#allocation11 + $0x110] sm:$0xff] }
 0x13d   :  { %515 = vmatpush1.msra.mxu1 %v500_v43  ;;  %v477_v43 = vld [vmem:[#allocation11 + $0x8] sm:$0xff] }
 0x13e   :  { %516 = vmatprep.subr.mxu1 %v499_v44  ;;  %v615_v44 = vld [vmem:[#allocation11 + $0x108] sm:$0xff] }
 0x13f   :  { %517 = vmatpush1.msra.mxu1 %v498_v62  ;;  %v595_v62 = vld [vmem:[#allocation13 + $0x70] sm:$0xff] }
 0x140   :  { %518 = vmatprep.subr.mxu1 %v497_v1  ;;  %v610_v1 = vld [vmem:[#allocation13 + $0xe8] sm:$0xff] }
 0x141   :  { %519 = vmatpush1.msra.mxu1 %v496_v4  ;;  %v594_v4 = vld [vmem:[#allocation13 + $0x68] sm:$0xff] }
 0x142   :  { %520 = vmatprep.subr.mxu1 %v495_v7  ;;  %v732_v7 = vld [vmem:[#allocation13 + $0x160] sm:$0xff] }
 0x143   :  { %521 = vmatpush1.msra.mxu1 %v494_v9  ;;  %v747_v9 = vld [vmem:[#allocation13 + $0x1d8] sm:$0xff] }
 0x144   :  { %522 = vmatprep.subr.mxu1 %v493_v11  ;;  %v731_v11 = vld [vmem:[#allocation13 + $0x158] sm:$0xff] }
 0x145   :  { %523 = vmatpush1.msra.mxu1 %v492_v13  ;;  %v746_v13 = vld [vmem:[#allocation13 + $0x1d0] sm:$0xff] }
 0x146   :  { %524 = vmatprep.subr.mxu1 %v491_v15  ;;  %v730_v15 = vld [vmem:[#allocation13 + $0x150] sm:$0xff] }
 0x147   :  { %525 = vmatpush1.msra.mxu1 %v490_v17  ;;  %v745_v17 = vld [vmem:[#allocation13 + $0x1c8] sm:$0xff] }
 0x148   :  { %526 = vmatprep.subr.mxu1 %v489_v19  ;;  %v729_v19 = vld [vmem:[#allocation13 + $0x148] sm:$0xff] }
 0x149   :  { %527 = vmatpush1.msra.mxu1 %v488_v21  ;;  %v744_v21 = vld [vmem:[#allocation13 + $0x1c0] sm:$0xff] }
 0x14a   :  { %528 = vmatprep.subr.mxu1 %v487_v23  ;;  %v728_v23 = vld [vmem:[#allocation13 + $0x140] sm:$0xff] }
 0x14b   :  { %529 = vmatpush1.msra.mxu1 %v486_v25  ;;  %v743_v25 = vld [vmem:[#allocation13 + $0x1b8] sm:$0xff] }
 0x14c   :  { %530 = vmatprep.subr.mxu1 %v485_v27  ;;  %v727_v27 = vld [vmem:[#allocation13 + $0x138] sm:$0xff] }
 0x14d   :  { %531 = vmatpush1.msra.mxu1 %v484_v29  ;;  %v742_v29 = vld [vmem:[#allocation13 + $0x1b0] sm:$0xff] }
 0x14e   :  { %532 = vmatprep.subr.mxu1 %v483_v31  ;;  %v726_v31 = vld [vmem:[#allocation13 + $0x130] sm:$0xff] }
 0x14f   :  { %533 = vmatpush1.msra.mxu1 %v482_v33  ;;  %v741_v33 = vld [vmem:[#allocation13 + $0x1a8] sm:$0xff] }
 0x150   :  { %534 = vmatprep.subr.mxu1 %v481_v35  ;;  %v725_v35 = vld [vmem:[#allocation13 + $0x128] sm:$0xff] }
 0x151   :  { %535 = vmatpush1.msra.mxu1 %v480_v37  ;;  %v740_v37 = vld [vmem:[#allocation13 + $0x1a0] sm:$0xff] }
 0x152   :  { %536 = vmatprep.subr.mxu1 %v479_v39  ;;  %v724_v39 = vld [vmem:[#allocation13 + $0x120] sm:$0xff] }
 0x153   :  { %537 = vmatpush1.msra.mxu1 %v478_v41  ;;  %v739_v41 = vld [vmem:[#allocation13 + $0x198] sm:$0xff] }
 0x154   :  { %538 = vmatprep.subr.mxu1 %v477_v43  ;;  %v723_v43 = vld [vmem:[#allocation13 + $0x118] sm:$0xff] }
 0x1bf   :  { %v362_v45 = vpop.xlane.xlu0 %361  ;;  %v380_v48 = vpop.xlane.xlu1 %379 }
 0x1c0   :  { %v363_v46 = vsel %vm1586_vm3, %v362_v45, 0.0  ;;  %v476_v45 = vld [vmem:[#allocation11] sm:$0xff] }
 0x1c1   :  { %539 = vmatpush1.msra.mxu1 %v476_v45  ;;  %v738_v45 = vld [vmem:[#allocation13 + $0x190] sm:$0xff] }
 0x1c3   :  { %v371_v47 = vpop.xlane.xlu0 %370 }
 0x1c4   :  { %v372_v49 = vsel %vm1599_vm4, %v371_v47, %v363_v46  ;;  %v614_v46 = vld [vmem:[#allocation11 + $0x100] sm:$0xff]  ;;  %v751_v47 = vld [vmem:[#allocation13 + $0x1f8] sm:$0xff] }
 0x1c5   :  { %v381_v50 = vsel %vm377_vm2, %v380_v48, %v372_v49  ;;  %1139 = vmatprep.subr.mxu1 %v751_v47  ;;  %v612_v48 = vld [vmem:[#allocation13 + $0xf8] sm:$0xff]  ;;  %v599_v47 = vld [vmem:[#allocation13 + $0x90] sm:$0xff] }
 0x1c6   :  { %v382_v51 = vsub.f32 %v1591_v18, %v381_v50  ;;  %v628_v18 = vld [vmem:[#allocation11 + $0x170] sm:$0xff] }
 0x1c8   :  { %v383_v52 = vmul.f32 1.442695, %v382_v51 }
 0x1ca   :  { %1294 = vpow2.f32 %v383_v52 }
 0x1d7   :  { %v1626_v54 = vpop.eup %1294 }
 0x1d8   :  { %1277 = vmatmul.mubr.f32.vlgmr.msra.gmra.mxu0 %v1626_v54 }
 0x1d9   :  { %647 = vmatpush1.msra.mxu0 %v644_v53  ;;  %710 = vmatprep.mubr.f32.mxu0 %v1479_v0 }
 0x1da   :  { %648 = vmatprep.subr.mxu0 %v643_v55 }
 0x1db   :  { %649 = vmatpush1.msra.mxu0 %v642_v56 }
 0x1dc   :  { %650 = vmatprep.subr.mxu0 %v641_v57  ;;  %v735_v57 = vld [vmem:[#allocation13 + $0x178] sm:$0xff] }
 0x1dd   :  { %651 = vmatpush1.msra.mxu0 %v640_v58  ;;  %v596_v58 = vld [vmem:[#allocation13 + $0x78] sm:$0xff] }
 0x1de   :  { %652 = vmatprep.subr.mxu0 %v639_v59  ;;  %v750_v59 = vld [vmem:[#allocation13 + $0x1f0] sm:$0xff] }
 0x1df   :  { %653 = vmatpush1.msra.mxu0 %v638_v60  ;;  %v611_v60 = vld [vmem:[#allocation13 + $0xf0] sm:$0xff] }
 0x1e0   :  { %654 = vmatprep.subr.mxu0 %v637_v61  ;;  %v734_v61 = vld [vmem:[#allocation13 + $0x170] sm:$0xff] }
 0x1e1   :  { %655 = vmatpush1.msra.mxu0 %v636_v63  ;;  %v749_v63 = vld [vmem:[#allocation13 + $0x1e8] sm:$0xff] }
 0x1e2   :  { %656 = vmatprep.subr.mxu0 %v635_v3  ;;  %v733_v3 = vld [vmem:[#allocation13 + $0x168] sm:$0xff] }
 0x1e3   :  { %657 = vmatpush1.msra.mxu0 %v634_v6  ;;  %v609_v6 = vld [vmem:[#allocation13 + $0xe0] sm:$0xff] }
 0x1e4   :  { %658 = vmatprep.subr.mxu0 %v633_v8  ;;  %v593_v8 = vld [vmem:[#allocation13 + $0x60] sm:$0xff] }
 0x1e5   :  { %659 = vmatpush1.msra.mxu0 %v632_v10  ;;  %v608_v10 = vld [vmem:[#allocation13 + $0xd8] sm:$0xff] }
 0x1e6   :  { %660 = vmatprep.subr.mxu0 %v631_v12  ;;  %v592_v12 = vld [vmem:[#allocation13 + $0x58] sm:$0xff] }
 0x1e7   :  { %661 = vmatpush1.msra.mxu0 %v630_v14  ;;  %v607_v14 = vld [vmem:[#allocation13 + $0xd0] sm:$0xff] }
 0x1e8   :  { %662 = vmatprep.subr.mxu0 %v629_v16  ;;  %v591_v16 = vld [vmem:[#allocation13 + $0x50] sm:$0xff] }
 0x1e9   :  { %663 = vmatpush1.msra.mxu0 %v628_v18  ;;  %v606_v18 = vld [vmem:[#allocation13 + $0xc8] sm:$0xff] }
 0x1ea   :  { %664 = vmatprep.subr.mxu0 %v627_v20  ;;  %v590_v20 = vld [vmem:[#allocation13 + $0x48] sm:$0xff] }
 0x1eb   :  { %665 = vmatpush1.msra.mxu0 %v626_v22  ;;  %v605_v22 = vld [vmem:[#allocation13 + $0xc0] sm:$0xff] }
 0x1ec   :  { %666 = vmatprep.subr.mxu0 %v625_v24  ;;  %v589_v24 = vld [vmem:[#allocation13 + $0x40] sm:$0xff] }
 0x1ed   :  { %667 = vmatpush1.msra.mxu0 %v624_v26  ;;  %v604_v26 = vld [vmem:[#allocation13 + $0xb8] sm:$0xff] }
 0x1ee   :  { %668 = vmatprep.subr.mxu0 %v623_v28  ;;  %v588_v28 = vld [vmem:[#allocation13 + $0x38] sm:$0xff] }
 0x1ef   :  { %669 = vmatpush1.msra.mxu0 %v622_v30  ;;  %v603_v30 = vld [vmem:[#allocation13 + $0xb0] sm:$0xff] }
 0x1f0   :  { %670 = vmatprep.subr.mxu0 %v621_v32  ;;  %v587_v32 = vld [vmem:[#allocation13 + $0x30] sm:$0xff] }
 0x1f1   :  { %671 = vmatpush1.msra.mxu0 %v620_v34  ;;  %v602_v34 = vld [vmem:[#allocation13 + $0xa8] sm:$0xff] }
 0x1f2   :  { %672 = vmatprep.subr.mxu0 %v619_v36  ;;  %v586_v36 = vld [vmem:[#allocation13 + $0x28] sm:$0xff] }
 0x1f3   :  { %673 = vmatpush1.msra.mxu0 %v618_v38  ;;  %v601_v38 = vld [vmem:[#allocation13 + $0xa0] sm:$0xff] }
 0x1f4   :  { %674 = vmatprep.subr.mxu0 %v617_v40  ;;  %v585_v40 = vld [vmem:[#allocation13 + $0x20] sm:$0xff] }
 0x1f5   :  { %675 = vmatpush1.msra.mxu0 %v616_v42  ;;  %v600_v42 = vld [vmem:[#allocation13 + $0x98] sm:$0xff] }
 0x1f6   :  { %676 = vmatprep.subr.mxu0 %v615_v44  ;;  %v584_v44 = vld [vmem:[#allocation13 + $0x18] sm:$0xff] }
 0x1f7   :  { %677 = vmatpush1.msra.mxu0 %v614_v46  ;;  %v722_v46 = vld [vmem:[#allocation13 + $0x110] sm:$0xff] }
 0x1f8   :  { %1174 = vmatprep.subr.mxu0 %v612_v48  ;;  %v737_v48 = vld [vmem:[#allocation13 + $0x188] sm:$0xff] }
 0x298   :  { %v467_v49 = vpop.f32.mrf.mxu0 }
 0x299   :  { %1296 = vrcp.f32 %v467_v49 }
 0x29a   :  { %v1278_v50 = vpop.f32.mrf.mxu0 }
 0x29b   :  { %v721_v50 = vld [vmem:[#allocation13 + $0x108] sm:$0xff] }
 0x2a6   :  { %v1297_v51 = vpop.eup %1296 }
 0x2a7   :  { %v472_v52 = vmul.f32 %v1297_v51, %v467_v49  ;;  %v583_v49 = vld [vmem:[#allocation13 + $0x10] sm:$0xff] }
 0x2a9   :  { %v473_v53 = vsub.f32 2.0, %v472_v52  ;;  %v736_v52 = vld [vmem:[#allocation13 + $0x180] sm:$0xff] }
 0x2ab   :  { %v474_v55 = vmul.f32 %v1297_v51, %v473_v53  ;;  %v598_v51 = vld [vmem:[#allocation13 + $0x88] sm:$0xff] }
 0x2ac   :  { %v582_v53 = vld [vmem:[#allocation13 + $0x8] sm:$0xff] }
 0x2ad   :  { %v1631_v56 = vmul.f32 %v1626_v54, %v474_v55  ;;  %v748_v54 = vld [vmem:[#allocation13 + $0x1e0] sm:$0xff] }
 0x2ae   :  { %v720_v55 = vld [vmem:[#allocation13 + $0x100] sm:$0xff] }
 0x2af   :  { %573 = vmatmul.mubr.f32.vlgmr.msra.gmra.mxu1 %v1631_v56  ;;  %711 = vmatmul.mubr.f32.vlgmr.msra.gmra.mxu0 %v1631_v56 }
 0x2b0   :  { %1140 = vmatpush3.msra.mxu1 %v735_v57  ;;  %1175 = vmatpush3.msra.mxu0 %v596_v58  ;;  %v597_v57 = vld [vmem:[#allocation13 + $0x80] sm:$0xff] }
 0x2b1   :  { %1141 = vmatprep.subr.mxu1 %v750_v59  ;;  %1176 = vmatprep.subr.mxu0 %v611_v60  ;;  %v581_v58 = vld [vmem:[#allocation13] sm:$0xff]  ;;  %v924_v59 = vld [vmem:[#allocation11 + $0x2f8] sm:$0xff]  ;;  %v347_v60 = vpop.f32.mrf.mxu1 }
 0x2b2   :  { %1142 = vmatpush3.msra.mxu1 %v734_v61  ;;  %1177 = vmatpush3.msra.mxu0 %v595_v62  ;;  %v269_v61 = vld [vmem:[#allocation8] sm:$0x3] }
 0x2b3   :  { %1143 = vmatprep.subr.mxu1 %v749_v63  ;;  %1178 = vmatprep.subr.mxu0 %v610_v1  ;;  %v278_v62 = vrot.slane %v269_v61, %v1578_v5  ;;  %v274_v63 = vrot.slane %v269_v61, %v1573_v2  ;;  %v349_v1 = vpop.f32.mrf.mxu1  ;;  %v923_v5 = vld [vmem:[#allocation11 + $0x2f0] sm:$0xff]  ;;  %v922_v2 = vld [vmem:[#allocation11 + $0x2e8] sm:$0xff] }
 0x2b4   :  { %1144 = vmatpush3.msra.mxu1 %v733_v3  ;;  %1179 = vmatpush3.msra.mxu0 %v594_v4  ;;  %v1005_v61 = vld [vmem:[#allocation13 + $0x230] sm:$0xff] }
 0x2b5   :  { %1145 = vmatprep.subr.mxu1 %v748_v54  ;;  %1180 = vmatprep.subr.mxu0 %v609_v6  ;;  %v1637_v54 = vadd.f32 %v349_v1, %v278_v62  ;;  %v1639_v6 = vadd.f32 %v347_v60, %v274_v63  ;;  %v1021_v60 = vld [vmem:[#allocation13 + $0x2b0] sm:$0xff]  ;;  %v1020_v62 = vld [vmem:[#allocation13 + $0x2a8] sm:$0xff]  ;;  %v1019_v1 = vld [vmem:[#allocation13 + $0x2a0] sm:$0xff] }
 0x2b6   :  { %1146 = vmatpush3.msra.mxu1 %v732_v7  ;;  %1181 = vmatpush3.msra.mxu0 %v593_v8  ;;  %v1004_v63 = vld [vmem:[#allocation13 + $0x228] sm:$0xff] }
 0x2b7   :  { %1147 = vmatprep.subr.mxu1 %v747_v9  ;;  %1182 = vmatprep.subr.mxu0 %v608_v10 }
 0x2b8   :  { %1148 = vmatpush3.msra.mxu1 %v731_v11  ;;  %1183 = vmatpush3.msra.mxu0 %v592_v12 }
 0x2b9   :  { %1149 = vmatprep.subr.mxu1 %v746_v13  ;;  %1184 = vmatprep.subr.mxu0 %v607_v14  ;;  %v921_v13 = vld [vmem:[#allocation11 + $0x2e0] sm:$0xff]  ;;  %v920_v14 = vld [vmem:[#allocation11 + $0x2d8] sm:$0xff] }
 0x2ba   :  { %1150 = vmatpush3.msra.mxu1 %v730_v15  ;;  %1185 = vmatpush3.msra.mxu0 %v591_v16  ;;  %v919_v15 = vld [vmem:[#allocation11 + $0x2d0] sm:$0xff]  ;;  %v918_v16 = vld [vmem:[#allocation11 + $0x2c8] sm:$0xff] }
 0x2bb   :  { %1151 = vmatprep.subr.mxu1 %v745_v17  ;;  %1186 = vmatprep.subr.mxu0 %v606_v18  ;;  %v917_v17 = vld [vmem:[#allocation11 + $0x2c0] sm:$0xff]  ;;  %v916_v18 = vld [vmem:[#allocation11 + $0x2b8] sm:$0xff] }
 0x2bc   :  { %1152 = vmatpush3.msra.mxu1 %v729_v19  ;;  %1187 = vmatpush3.msra.mxu0 %v590_v20  ;;  %v915_v19 = vld [vmem:[#allocation11 + $0x2b0] sm:$0xff]  ;;  %v914_v20 = vld [vmem:[#allocation11 + $0x2a8] sm:$0xff] }
 0x2bd   :  { %1153 = vmatprep.subr.mxu1 %v744_v21  ;;  %1188 = vmatprep.subr.mxu0 %v605_v22  ;;  %v913_v21 = vld [vmem:[#allocation11 + $0x2a0] sm:$0xff]  ;;  %v912_v22 = vld [vmem:[#allocation11 + $0x298] sm:$0xff] }
 0x2be   :  { %1154 = vmatpush3.msra.mxu1 %v728_v23  ;;  %1189 = vmatpush3.msra.mxu0 %v589_v24  ;;  %v911_v23 = vld [vmem:[#allocation11 + $0x290] sm:$0xff]  ;;  %v909_v24 = vld [vmem:[#allocation11 + $0x280] sm:$0xff] }
 0x2bf   :  { %1155 = vmatprep.subr.mxu1 %v743_v25  ;;  %1190 = vmatprep.subr.mxu0 %v604_v26  ;;  %v908_v25 = vld [vmem:[#allocation11 + $0x278] sm:$0xff]  ;;  %v907_v26 = vld [vmem:[#allocation11 + $0x270] sm:$0xff] }
 0x2c0   :  { %1156 = vmatpush3.msra.mxu1 %v727_v27  ;;  %1191 = vmatpush3.msra.mxu0 %v588_v28  ;;  %v906_v27 = vld [vmem:[#allocation11 + $0x268] sm:$0xff]  ;;  %v905_v28 = vld [vmem:[#allocation11 + $0x260] sm:$0xff] }
 0x2c1   :  { %1157 = vmatprep.subr.mxu1 %v742_v29  ;;  %1192 = vmatprep.subr.mxu0 %v603_v30  ;;  %v904_v29 = vld [vmem:[#allocation11 + $0x258] sm:$0xff]  ;;  %v903_v30 = vld [vmem:[#allocation11 + $0x250] sm:$0xff] }
 0x2c2   :  { %1158 = vmatpush3.msra.mxu1 %v726_v31  ;;  %1193 = vmatpush3.msra.mxu0 %v587_v32  ;;  %v902_v31 = vld [vmem:[#allocation11 + $0x248] sm:$0xff]  ;;  %v901_v32 = vld [vmem:[#allocation11 + $0x240] sm:$0xff] }
 0x2c3   :  { %1159 = vmatprep.subr.mxu1 %v741_v33  ;;  %1194 = vmatprep.subr.mxu0 %v602_v34  ;;  %v900_v33 = vld [vmem:[#allocation11 + $0x238] sm:$0xff]  ;;  %v899_v34 = vld [vmem:[#allocation11 + $0x230] sm:$0xff] }
 0x2c4   :  { %1160 = vmatpush3.msra.mxu1 %v725_v35  ;;  %1195 = vmatpush3.msra.mxu0 %v586_v36  ;;  %v898_v35 = vld [vmem:[#allocation11 + $0x228] sm:$0xff]  ;;  %v897_v36 = vld [vmem:[#allocation11 + $0x220] sm:$0xff] }
 0x2c5   :  { %1161 = vmatprep.subr.mxu1 %v740_v37  ;;  %1196 = vmatprep.subr.mxu0 %v601_v38  ;;  %v896_v37 = vld [vmem:[#allocation11 + $0x218] sm:$0xff]  ;;  %v895_v38 = vld [vmem:[#allocation11 + $0x210] sm:$0xff] }
 0x2c6   :  { %1162 = vmatpush3.msra.mxu1 %v724_v39  ;;  %1197 = vmatpush3.msra.mxu0 %v585_v40  ;;  %v894_v39 = vld [vmem:[#allocation11 + $0x208] sm:$0xff]  ;;  %v893_v40 = vld [vmem:[#allocation11 + $0x200] sm:$0xff] }
 0x2c7   :  { %1163 = vmatprep.subr.mxu1 %v739_v41  ;;  %1198 = vmatprep.subr.mxu0 %v600_v42  ;;  %v1030_v41 = vld [vmem:[#allocation13 + $0x2f8] sm:$0xff] }
 0x2c8   :  { %1164 = vmatpush3.msra.mxu1 %v723_v43  ;;  %1199 = vmatpush3.msra.mxu0 %v584_v44  ;;  %v1014_v42 = vld [vmem:[#allocation13 + $0x278] sm:$0xff]  ;;  %v1029_v43 = vld [vmem:[#allocation13 + $0x2f0] sm:$0xff] }
 0x2c9   :  { %1165 = vmatprep.subr.mxu1 %v738_v45  ;;  %1200 = vmatprep.subr.mxu0 %v599_v47  ;;  %v1013_v44 = vld [vmem:[#allocation13 + $0x270] sm:$0xff]  ;;  %v1028_v45 = vld [vmem:[#allocation13 + $0x2e8] sm:$0xff]  ;;  %v1027_v47 = vld [vmem:[#allocation13 + $0x2e0] sm:$0xff] }
 0x2ca   :  { %1166 = vmatpush3.msra.mxu1 %v722_v46  ;;  %1201 = vmatpush3.msra.mxu0 %v583_v49  ;;  %v1012_v46 = vld [vmem:[#allocation13 + $0x268] sm:$0xff]  ;;  %v1026_v49 = vld [vmem:[#allocation13 + $0x2d8] sm:$0xff] }
 0x2cb   :  { %1167 = vmatprep.subr.mxu1 %v737_v48  ;;  %1202 = vmatprep.subr.mxu0 %v598_v51  ;;  %v1011_v48 = vld [vmem:[#allocation13 + $0x260] sm:$0xff]  ;;  %v1025_v51 = vld [vmem:[#allocation13 + $0x2d0] sm:$0xff] }
 0x2cc   :  { %1168 = vmatpush3.msra.mxu1 %v721_v50  ;;  %1203 = vmatpush3.msra.mxu0 %v582_v53  ;;  %v1010_v50 = vld [vmem:[#allocation13 + $0x258] sm:$0xff]  ;;  %v1008_v53 = vld [vmem:[#allocation13 + $0x248] sm:$0xff] }
 0x2cd   :  { %1169 = vmatprep.subr.mxu1 %v736_v52  ;;  %1204 = vmatprep.subr.mxu0 %v597_v57  ;;  %v1024_v52 = vld [vmem:[#allocation13 + $0x2c8] sm:$0xff]  ;;  %v1007_v57 = vld [vmem:[#allocation13 + $0x240] sm:$0xff] }
 0x2ce   :  { %1170 = vmatpush3.msra.mxu1 %v720_v55  ;;  %1205 = vmatpush3.msra.mxu0 %v581_v58  ;;  %v1023_v55 = vld [vmem:[#allocation13 + $0x2c0] sm:$0xff]  ;;  %v1022_v58 = vld [vmem:[#allocation13 + $0x2b8] sm:$0xff] }
 0x2cf   :  { %925 = vmatprep.subr.mxu1 %v924_v59  ;;  %1209 = vmatprep.subr.mxu0 %v1030_v41  ;;  %v1006_v59 = vld [vmem:[#allocation13 + $0x238] sm:$0xff] }
 0x36f   :  { %v574_v3 = vpop.f32.mrf.mxu1  ;;  %v712_v4 = vpop.f32.mrf.mxu0 }
 0x370   :  { %v579_v11 = vmul.f32 %v574_v3, %v1639_v6  ;;  %v717_v12 = vmul.f32 %v712_v4, %v1639_v6  ;;  %v1003_v3 = vld [vmem:[#allocation13 + $0x220] sm:$0xff]  ;;  %v1018_v4 = vld [vmem:[#allocation13 + $0x298] sm:$0xff] }
 0x371   :  { %v576_v7 = vpop.f32.mrf.mxu1  ;;  %v714_v8 = vpop.f32.mrf.mxu0 }
 0x372   :  { %v580_v9 = vmul.f32 %v576_v7, %v1637_v54  ;;  %v718_v10 = vmul.f32 %v714_v8, %v1637_v54  ;;  %v1002_v7 = vld [vmem:[#allocation13 + $0x218] sm:$0xff]  ;;  %v1017_v8 = vld [vmem:[#allocation13 + $0x290] sm:$0xff] }
 0x374   :  { %816 = vmatprep.mubr.f32.mxu1 %v718_v10  ;;  %886 = vmatprep.mubr.f32.mxu0 %v580_v9  ;;  %v1001_v9 = vld [vmem:[#allocation13 + $0x210] sm:$0xff]  ;;  %v1016_v10 = vld [vmem:[#allocation13 + $0x288] sm:$0xff] }
 0x375   :  { %817 = vmatmul.mubr.f32.vlgmr.msra.gmra.mxu1 %v717_v12  ;;  %887 = vmatmul.mubr.f32.vlgmr.msra.gmra.mxu0 %v579_v11  ;;  %v1000_v11 = vld [vmem:[#allocation13 + $0x208] sm:$0xff]  ;;  %v1015_v12 = vld [vmem:[#allocation13 + $0x280] sm:$0xff] }
 0x376   :  { %926 = vmatpush1.msra.mxu1 %v923_v5  ;;  %989 = vmatprep.mubr.f32.mxu1 %v1479_v0  ;;  %v910_v0 = vld [vmem:[#allocation11 + $0x288] sm:$0xff]  ;;  %v999_v5 = vld [vmem:[#allocation13 + $0x200] sm:$0xff] }
 0x377   :  { %927 = vmatprep.subr.mxu1 %v922_v2  ;;  %1210 = vmatpush3.msra.mxu0 %v1014_v42 }
 0x378   :  { %928 = vmatpush1.msra.mxu1 %v921_v13  ;;  %1211 = vmatprep.subr.mxu0 %v1029_v43 }
 0x379   :  { %929 = vmatprep.subr.mxu1 %v920_v14  ;;  %1212 = vmatpush3.msra.mxu0 %v1013_v44 }
 0x37a   :  { %930 = vmatpush1.msra.mxu1 %v919_v15  ;;  %1213 = vmatprep.subr.mxu0 %v1028_v45 }
 0x37b   :  { %931 = vmatprep.subr.mxu1 %v918_v16  ;;  %1214 = vmatpush3.msra.mxu0 %v1012_v46 }
 0x37c   :  { %932 = vmatpush1.msra.mxu1 %v917_v17  ;;  %1215 = vmatprep.subr.mxu0 %v1027_v47 }
 0x37d   :  { %933 = vmatprep.subr.mxu1 %v916_v18  ;;  %1216 = vmatpush3.msra.mxu0 %v1011_v48 }
 0x37e   :  { %934 = vmatpush1.msra.mxu1 %v915_v19  ;;  %1217 = vmatprep.subr.mxu0 %v1026_v49 }
 0x37f   :  { %935 = vmatprep.subr.mxu1 %v914_v20  ;;  %1218 = vmatpush3.msra.mxu0 %v1010_v50 }
 0x380   :  { %936 = vmatpush1.msra.mxu1 %v913_v21  ;;  %1219 = vmatprep.subr.mxu0 %v1025_v51 }
 0x381   :  { %937 = vmatprep.subr.mxu1 %v912_v22 }
 0x382   :  { %938 = vmatpush1.msra.mxu1 %v911_v23 }
 0x383   :  { %939 = vmatprep.subr.mxu1 %v910_v0 }
 0x384   :  { %940 = vmatpush1.msra.mxu1 %v909_v24 }
 0x385   :  { %941 = vmatprep.subr.mxu1 %v908_v25 }
 0x386   :  { %942 = vmatpush1.msra.mxu1 %v907_v26 }
 0x387   :  { %943 = vmatprep.subr.mxu1 %v906_v27 }
 0x388   :  { %944 = vmatpush1.msra.mxu1 %v905_v28 }
 0x389   :  { %945 = vmatprep.subr.mxu1 %v904_v29 }
 0x38a   :  { %946 = vmatpush1.msra.mxu1 %v903_v30 }
 0x38b   :  { %947 = vmatprep.subr.mxu1 %v902_v31 }
 0x38c   :  { %948 = vmatpush1.msra.mxu1 %v901_v32 }
 0x38d   :  { %949 = vmatprep.subr.mxu1 %v900_v33 }
 0x38e   :  { %950 = vmatpush1.msra.mxu1 %v899_v34 }
 0x38f   :  { %951 = vmatprep.subr.mxu1 %v898_v35 }
 0x390   :  { %952 = vmatpush1.msra.mxu1 %v897_v36 }
 0x391   :  { %953 = vmatprep.subr.mxu1 %v896_v37 }
 0x392   :  { %954 = vmatpush1.msra.mxu1 %v895_v38 }
 0x393   :  { %955 = vmatprep.subr.mxu1 %v894_v39 }
 0x394   :  { %956 = vmatpush1.msra.mxu1 %v893_v40 }
 0x395   :  { %990 = vmatmul.mubr.f32.vlgmr.msra.gmra.mxu1 %v1631_v56  ;;  %v1009_v56 = vld [vmem:[#allocation13 + $0x250] sm:$0xff] }
 0x396   :  { %1220 = vmatpush3.msra.mxu0 %v1009_v56 }
 0x397   :  { %1221 = vmatprep.subr.mxu0 %v1024_v52 }
 0x398   :  { %1222 = vmatpush3.msra.mxu0 %v1008_v53 }
 0x399   :  { %1223 = vmatprep.subr.mxu0 %v1023_v55 }
 0x39a   :  { %1224 = vmatpush3.msra.mxu0 %v1007_v57 }
 0x39b   :  { %1225 = vmatprep.subr.mxu0 %v1022_v58 }
 0x39c   :  { %1226 = vmatpush3.msra.mxu0 %v1006_v59 }
 0x39d   :  { %1227 = vmatprep.subr.mxu0 %v1021_v60 }
 0x39e   :  { %1228 = vmatpush3.msra.mxu0 %v1005_v61 }
 0x39f   :  { %1229 = vmatprep.subr.mxu0 %v1020_v62 }
 0x3a0   :  { %1230 = vmatpush3.msra.mxu0 %v1004_v63 }
 0x3a1   :  { %1231 = vmatprep.subr.mxu0 %v1019_v1 }
 0x3a2   :  { %1232 = vmatpush3.msra.mxu0 %v1003_v3 }
 0x3a3   :  { %1233 = vmatprep.subr.mxu0 %v1018_v4 }
 0x3a4   :  { %1234 = vmatpush3.msra.mxu0 %v1002_v7 }
 0x3a5   :  { %1235 = vmatprep.subr.mxu0 %v1017_v8 }
 0x3a6   :  { %1236 = vmatpush3.msra.mxu0 %v1001_v9 }
 0x3a7   :  { %1237 = vmatprep.subr.mxu0 %v1016_v10 }
 0x3a8   :  { %1238 = vmatpush3.msra.mxu0 %v1000_v11 }
 0x3a9   :  { %1239 = vmatprep.subr.mxu0 %v1015_v12 }
 0x3aa   :  { %1240 = vmatpush3.msra.mxu0 %v999_v5 }
 0x435   :  { %v1171_v2 = vpop.f32.mrf.mxu1  ;;  %v1206_v19 = vpop.f32.mrf.mxu0 }
 0x437   :  { %v1172_v13 = vpop.f32.mrf.mxu1  ;;  %v1207_v20 = vpop.f32.mrf.mxu0 }
 0x438   :  { %v1173_v14 = vadd.f32 %v1172_v13, %v1171_v2  ;;  %v1208_v21 = vadd.f32 %v1207_v20, %v1206_v19 }
 0x43a   :  { %v889_v0 = vadd.f32 %v1208_v21, %v1173_v14 }
 0x455   :  { %v991_v15 = vpop.f32.mrf.mxu1 }
 0x456   :  { %v996_v18 = vmul.f32 %v991_v15, %v1639_v6 }
 0x457   :  { %v993_v16 = vpop.f32.mrf.mxu1 }
 0x458   :  { %v997_v17 = vmul.f32 %v993_v16, %v1637_v54 }
 0x45a   :  { %1095 = vmatprep.mubr.f32.mxu0 %v997_v17 }
 0x45b   :  { %1096 = vmatmul.mubr.f32.vlgmr.msra.gmra.mxu0 %v996_v18 }
 0x51b   :  { %v1241_v22 = vpop.f32.mrf.mxu0 }
 0x51d   :  { %v1242_v23 = vpop.f32.mrf.mxu0 }
 0x51e   :  { %v1243_v24 = vadd.f32 %v1242_v23, %v1241_v22 }
 0x520   :  { %v1101_v25 = vadd.f32 %v1243_v24, %v889_v0 }
 0x522   :  { %1102 = vst [vmem:[#allocation14] sm:$0xff] %v1101_v25 }
 0x523   :  { %1449 = shalt.err (!%p1446_p11)
}
 0x524   :  { %1112 = dma.vmem_to_hbm [thread:$0]  %s1110_s5, 128, %s1661_s9, [#allocation4]  }
 0x525   :  { %1466 = dma.done.wait [#allocation4], 128  }
 0x526   :  { %1467 = vsyncadd [#allocation4], 4294967168 }
 0x527   :  { %1116 = vsyncpa [#allocation3], 1 }
 0x528   :  { %1117 = vsyncpa [#allocation6], 1 }
 0x529   :  { %1118 = vsyncpa [#allocation9], 1 }
 0x52a   :  { %1119 = vsyncpa [#allocation12], 1 }
 0x52b   :  { %1120 = vsyncpa [#allocation4], 1 }

</bundles_post_ra>
